<compile_context>
chip_gen: v7x
topology: tpu7x:2x2x1
jax: 0.10.0
libtpu: 0.0.40
codegen_flags: <defaults>
</compile_context>

<pallas_src>
import jax
import jax.numpy as jnp
from jax import lax
from jax.experimental import pallas as pl
from jax.experimental.pallas import tpu as pltpu


# Scoped VMEM budget: leaves headroom on v7x (64 MiB physical) while allowing
# larger-than-default windows on v5e/v6e (128 MiB physical).
_VMEM_LIMIT = 48 * 1024 * 1024


# ---------------------------------------------------------------------------
# helpers
# ---------------------------------------------------------------------------
def _interp_matrix(n_in, n_out):
    """Linear-interp weights identical to Upsample(bilinear, align_corners=True)."""
    if n_out == 1:
        src = jnp.zeros((1,), jnp.float32)
    else:
        src = jnp.arange(n_out, dtype=jnp.float32) * (n_in - 1) / (n_out - 1)
    j0 = jnp.clip(jnp.floor(src).astype(jnp.int32), 0, n_in - 1)
    j1 = jnp.clip(j0 + 1, 0, n_in - 1)
    frac = src - j0.astype(jnp.float32)
    rows = jnp.arange(n_out)
    m = jnp.zeros((n_out, n_in), jnp.float32)
    m = m.at[rows, j0].add(1.0 - frac)
    m = m.at[rows, j1].add(frac)
    return m


def _valid_mask(H, W):
    """(1, Lp) f32 mask of the valid (non-ring) pixels of the padded plane."""
    Wp = W + 2
    Lp = (H + 2) * Wp
    lane = jnp.arange(Lp, dtype=jnp.int32)
    yy = lane // Wp
    xx = lane - yy * Wp
    valid = (yy >= 1) & (yy <= H) & (xx >= 1) & (xx <= W)
    return valid.astype(jnp.float32).reshape(1, Lp)


# ---------------------------------------------------------------------------
# Kernel 1: fused bilinear 2x upsample -> padded canvas (per image)
# ---------------------------------------------------------------------------
def _make_upsample_kernel(C1, H1, W1, H1u, W1u, off_y, off_x):
    def kernel(uwT_ref, uh_ref, x_ref, o_ref):
        # zero the whole canvas (ring + diff padding), then fill the interior
        o_ref[...] = jnp.zeros_like(o_ref)
        x = x_ref[0].astype(jnp.float32)                       # (C1, H1, W1)
        t = jnp.dot(x.reshape(C1 * H1, W1), uwT_ref[...],
                    preferred_element_type=jnp.float32)        # W interp on MXU
        t = t.reshape(C1, H1, W1u)
        uh = uh_ref[...]
        # TODO(synk): the per-channel H-interp loop unrolls over C1; fine for
        # small decoder channel counts, would need a batched dot for large C1.
        for c in range(C1):
            yc = jnp.dot(uh, t[c], preferred_element_type=jnp.float32)
            o_ref[0, c, off_y:off_y + H1u, off_x:off_x + W1u] = yc
    return kernel


def upsample_to_canvas(x1, H2, W2):
    """Bilinear 2x upsample of x1, placed into a zero (H2+2, W2+2) canvas at the
    F.pad offsets.  Returns (N, C1, Lp) flattened, ready for the conv kernel."""
    N, C1, H1, W1 = x1.shape
    H1u, W1u = 2 * H1, 2 * W1
    Hp, Wp = H2 + 2, W2 + 2
    dY, dX = H2 - H1u, W2 - W1u
    off_y, off_x = dY // 2 + 1, dX // 2 + 1
    uwT = _interp_matrix(W1, W1u).T                            # (W1, W1u)
    uh = _interp_matrix(H1, H1u)                               # (H1u, H1)

    canvas = pl.pallas_call(
        _make_upsample_kernel(C1, H1, W1, H1u, W1u, off_y, off_x),
        out_shape=jax.ShapeDtypeStruct((N, C1, Hp, Wp), jnp.float32),
        grid_spec=pltpu.PrefetchScalarGridSpec(
            num_scalar_prefetch=0,
            grid=(N,),
            in_specs=[pl.BlockSpec((W1, W1u), lambda n: (0, 0)),
                      pl.BlockSpec((H1u, H1), lambda n: (0, 0)),
                      pl.BlockSpec((1, C1, H1, W1), lambda n: (n, 0, 0, 0))],
            out_specs=pl.BlockSpec((1, C1, Hp, Wp), lambda n: (n, 0, 0, 0)),
        ),
        compiler_params=pltpu.CompilerParams(
            dimension_semantics=("parallel",),
            vmem_limit_bytes=_VMEM_LIMIT),
        cost_estimate=pl.CostEstimate(
            flops=2 * N * C1 * (H1 * W1 * W1u + H1 * H1u * W1u),
            transcendentals=0,
            bytes_accessed=4 * (N * C1 * (H1 * W1 + Hp * Wp))),
    )(uwT, uh, x1)
    return canvas.reshape(N, C1, Hp * Wp)          # free metadata reshape


# ---------------------------------------------------------------------------
# Kernel 2: 3x3 conv (pad=1) + bias + ring mask + per-image BN partial stats.
#   Accepts a LIST of channel-sliced activations (the torch.cat happens inside
#   a VMEM scratch), all in the ring-padded flattened (N, C, Lp) layout.
# ---------------------------------------------------------------------------
def _make_conv_kernel(H, W, cins, Cout):
    Wp = W + 2
    Hp = H + 2
    Lp = Hp * Wp
    pad_end = Wp + 1
    Lpe = Lp + 2 * pad_end
    Ctot = sum(cins)
    inv_cnt = 1.0 / float(H * W)

    def kernel(mask_ref, *refs):
        x_refs = refs[:len(cins)]
        w_ref, b_ref, y_ref, s_ref, css_ref, xe = refs[len(cins):]

        # Build the lane-extended, channel-concatenated activation in VMEM
        # (the HBM layout stays plain (N, C, Lp); extension + concat are free
        # here versus a full extra HBM pass).
        xe[:, pl.ds(0, pad_end)] = jnp.zeros((Ctot, pad_end), jnp.float32)
        xe[:, pl.ds(pad_end + Lp, pad_end)] = jnp.zeros((Ctot, pad_end), jnp.float32)
        row = 0
        for x_ref, ci in zip(x_refs, cins):
            xe[row:row + ci, pl.ds(pad_end, Lp)] = x_ref[0].astype(jnp.float32)
            row += ci

        # Tap-stacked activation: one (Cout, 9*Ctot) @ (9*Ctot, Lp) MXU dot.
        taps = [xe[:, pl.ds((t // 3) * Wp + (t % 3), Lp)] for t in range(9)]
        stacked = jnp.concatenate(taps, axis=0)                 # (9*Ctot, Lp)
        acc = jnp.dot(w_ref[...], stacked,
                      preferred_element_type=jnp.float32)       # (Cout, Lp)

        mask = mask_ref[...]                                    # (1, Lp)
        acc = (acc + b_ref[...]) * mask                         # bias + zero ring
        y_ref[...] = acc[None]

        # Per-image BN partial stats: sum and centered sum of squares
        # (parallel-variance combine in the wrapper; avoids E[x^2]-E[x]^2
        # cancellation and keeps the batch grid axis race-free / "parallel").
        s = jnp.sum(acc, axis=1, keepdims=True)                 # (Cout, 1)
        mean = s * inv_cnt
        dev = (acc - mean) * mask
        s_ref[...] = s[None]
        css_ref[...] = jnp.sum(dev * dev, axis=1, keepdims=True)[None]

    return kernel


def conv3x3_bn_stats(inputs, w, b, H, W, mask):
    """inputs: list of (N, Cin_i, Lp) ring-padded flattened activations.
    Returns (y, s, css): y (N,Cout,Lp) ring-masked conv+bias, per-image stats."""
    N = inputs[0].shape[0]
    cins = tuple(int(a.shape[1]) for a in inputs)
    Ctot = sum(cins)
    Cout = w.shape[0]
    Wp = W + 2
    Lp = (H + 2) * Wp
    pad_end = Wp + 1
    Lpe = Lp + 2 * pad_end

    # tap-major weight layout matching the in-kernel tap stacking
    wk = jnp.transpose(w, (0, 2, 3, 1)).reshape(Cout, 9 * Ctot).astype(jnp.float32)
    bk = b.reshape(Cout, 1).astype(jnp.float32)

    in_specs = [pl.BlockSpec((1, Lp), lambda n: (0, 0))]        # resident mask
    for _ in cins:
        in_specs.append(pl.BlockSpec((1, None, Lp), lambda n: (n, 0, 0)))
    # (fix the per-input channel dims)
    in_specs = [in_specs[0]] + [
        pl.BlockSpec((1, ci, Lp), lambda n: (n, 0, 0)) for ci in cins
    ] + [pl.BlockSpec((Cout, 9 * Ctot), lambda n: (0, 0)),
         pl.BlockSpec((Cout, 1), lambda n: (0, 0))]

    # TODO(synk): large decoder stages (big Cin or H*W) need an Lp / Cin tiling
    # grid axis with a halo + accumulator; per-image blocks are fine here.
    y, s, css = pl.pallas_call(
        _make_conv_kernel(H, W, cins, Cout),
        out_shape=(jax.ShapeDtypeStruct((N, Cout, Lp), jnp.float32),
                   jax.ShapeDtypeStruct((N, Cout, 1), jnp.float32),
                   jax.ShapeDtypeStruct((N, Cout, 1), jnp.float32)),
        grid_spec=pltpu.PrefetchScalarGridSpec(
            num_scalar_prefetch=0,
            grid=(N,),
            in_specs=in_specs,
            out_specs=(pl.BlockSpec((1, Cout, Lp), lambda n: (n, 0, 0)),
                       pl.BlockSpec((1, Cout, 1), lambda n: (n, 0, 0)),
                       pl.BlockSpec((1, Cout, 1), lambda n: (n, 0, 0))),
            scratch_shapes=[pltpu.VMEM((Ctot, Lpe), jnp.float32)],
        ),
        compiler_params=pltpu.CompilerParams(
            dimension_semantics=("parallel",),
            vmem_limit_bytes=_VMEM_LIMIT),
        cost_estimate=pl.CostEstimate(
            flops=2 * N * Cout * 9 * Ctot * Lp, transcendentals=0,
            bytes_accessed=4 * (N * Ctot * Lp + N * Cout * Lp + 9 * Cout * Ctot)),
    )(mask, *inputs, wk, bk)
    return y, s, css


# ---------------------------------------------------------------------------
# Kernel 3: BN apply + ReLU, ring re-zeroed, output layout = next conv's input
# ---------------------------------------------------------------------------
def _bn_relu_kernel(x_ref, sc_ref, sh_ref, mask_ref, o_ref):
    x = x_ref[0]                                                # (Cout, Lp)
    y = jnp.maximum(x * sc_ref[...] + sh_ref[...], 0.0) * mask_ref[...]
    o_ref[...] = y[None].astype(o_ref.dtype)


def bn_relu_apply(y, scale, shift, mask):
    N, Cout, Lp = y.shape
    return pl.pallas_call(
        _bn_relu_kernel,
        out_shape=jax.ShapeDtypeStruct((N, Cout, Lp), jnp.float32),
        grid_spec=pltpu.PrefetchScalarGridSpec(
            num_scalar_prefetch=0,
            grid=(N,),
            in_specs=[pl.BlockSpec((1, Cout, Lp), lambda n: (n, 0, 0)),
                      pl.BlockSpec((Cout, 1), lambda n: (0, 0)),
                      pl.BlockSpec((Cout, 1), lambda n: (0, 0)),
                      pl.BlockSpec((1, Lp), lambda n: (0, 0))],
            out_specs=pl.BlockSpec((1, Cout, Lp), lambda n: (n, 0, 0)),
        ),
        compiler_params=pltpu.CompilerParams(
            dimension_semantics=("parallel",),
            vmem_limit_bytes=_VMEM_LIMIT),
        cost_estimate=pl.CostEstimate(
            flops=3 * N * Cout * Lp, transcendentals=0,
            bytes_accessed=4 * 2 * N * Cout * Lp),
    )(y, scale, shift, mask)


# ---------------------------------------------------------------------------
# BatchNorm batch statistics (training-mode forward, biased variance)
# ---------------------------------------------------------------------------
def _bn_scale_shift(s, css, cnt_per_img, gamma, beta, eps=1e-5):
    s = s[:, :, 0]                                             # (N, Cout)
    css = css[:, :, 0]
    n_img = s.shape[0]
    total = float(n_img * cnt_per_img)
    mean_n = s / cnt_per_img
    mean = jnp.sum(s, axis=0) / total                          # (Cout,)
    var = (jnp.sum(css, axis=0)
           + cnt_per_img * jnp.sum((mean_n - mean[None, :]) ** 2, axis=0)) / total
    scale = gamma * lax.rsqrt(var + eps)
    shift = beta - mean * scale
    return (scale.reshape(-1, 1).astype(jnp.float32),
            shift.reshape(-1, 1).astype(jnp.float32))


# ---------------------------------------------------------------------------
# Full Up.forward
# ---------------------------------------------------------------------------
def up_forward(x1, x2, params):
    N, C1, H1, W1 = x1.shape
    _, C2, H2, W2 = x2.shape
    Hp, Wp = H2 + 2, W2 + 2
    Lp = Hp * Wp

    # self.up(x1) + F.pad: fused into one kernel producing conv-ready layout
    x1_lay = upsample_to_canvas(x1, H2, W2)                    # (N, C1, Lp)

    # x2 ring pad: one fused XLA layout pass (metadata reshape afterwards)
    x2_lay = jnp.pad(x2, ((0, 0), (0, 0), (1, 1), (1, 1))
                     ).reshape(N, C2, Lp).astype(jnp.float32)

    mask = _valid_mask(H2, W2)                                 # (1, Lp)

    def stage(acts, w, b, gamma, beta):
        y, s, css = conv3x3_bn_stats(acts, w, b, H2, W2, mask)
        scale, shift = _bn_scale_shift(s, css, H2 * W2, gamma, beta)
        return bn_relu_apply(y, scale, shift, mask)

    # torch.cat([x2, x1], dim=1) happens inside the conv kernel's VMEM scratch.
    h = stage([x2_lay, x1_lay], params["w1"], params["b1"],
              params["g1"], params["bt1"])
    h = stage([h], params["w2"], params["b2"], params["g2"], params["bt2"])

    Cout = h.shape[1]
    return h.reshape(N, Cout, Hp, Wp)[:, :, 1:-1, 1:-1]


# ---------------------------------------------------------------------------
# Pure-JAX reference (correctness check)
# ---------------------------------------------------------------------------
def up_forward_ref(x1, x2, params):
    N, C1, H1, W1 = x1.shape
    _, C2, H2, W2 = x2.shape
    hp = jax.lax.Precision.HIGHEST
    uh = _interp_matrix(H1, 2 * H1)
    uw = _interp_matrix(W1, 2 * W1)
    x1u = jnp.einsum("Hh,nchw->ncHw", uh, x1, precision=hp)
    x1u = jnp.einsum("Ww,ncHw->ncHW", uw, x1u, precision=hp)
    dY, dX = H2 - 2 * H1, W2 - 2 * W1
    x1u = jnp.pad(x1u, ((0, 0), (0, 0),
                        (dY // 2, dY - dY // 2), (dX // 2, dX - dX // 2)))
    x = jnp.concatenate([x2, x1u], axis=1)

    def conv_bn_relu(inp, w, b, gamma, beta):
        y = jax.lax.conv_general_dilated(
            inp, w, (1, 1), ((1, 1), (1, 1)),
            dimension_numbers=("NCHW", "OIHW", "NCHW"), precision=hp)
        y = y + b[None, :, None, None]
        mean = jnp.mean(y, axis=(0, 2, 3), keepdims=True)
        var = jnp.var(y, axis=(0, 2, 3), keepdims=True)
        y = (y - mean) / jnp.sqrt(var + 1e-5)
        y = y * gamma[None, :, None, None] + beta[None, :, None, None]
        return jnp.maximum(y, 0.0)

    y = conv_bn_relu(x, params["w1"], params["b1"], params["g1"], params["bt1"])
    y = conv_bn_relu(y, params["w2"], params["b2"], params["g2"], params["bt2"])
    return y


if __name__ == "__main__":
    key = jax.random.PRNGKey(0)
    N = 2
    C1 = C2 = 4                  # x1 (to upsample) / x2 (skip) channels
    H1 = W1 = 8                  # x1 spatial; x2 is 2x
    H2 = W2 = 16
    Cin = C1 + C2                # DoubleConv in_channels = 8
    Cout = 8                     # out_channels

    ks = jax.random.split(key, 6)
    x1 = jax.random.normal(ks[0], (N, C1, H1, W1), jnp.float32)
    x2 = jax.random.normal(ks[1], (N, C2, H2, W2), jnp.float32)
    params = dict(
        w1=0.1 * jax.random.normal(ks[2], (Cout, Cin, 3, 3), jnp.float32),
        b1=0.1 * jax.random.normal(ks[3], (Cout,), jnp.float32),
        g1=jnp.ones((Cout,), jnp.float32),
        bt1=jnp.zeros((Cout,), jnp.float32),
        w2=0.1 * jax.random.normal(ks[4], (Cout, Cout, 3, 3), jnp.float32),
        b2=0.1 * jax.random.normal(ks[5], (Cout,), jnp.float32),
        g2=jnp.ones((Cout,), jnp.float32),
        bt2=jnp.zeros((Cout,), jnp.float32),
    )

    out = jax.jit(up_forward)(x1, x2, params)
    jax.block_until_ready(out)
    assert out.shape == (N, Cout, H2, W2)

    ref = up_forward_ref(x1, x2, params)
    err = float(jnp.max(jnp.abs(out - ref)))
    assert jnp.allclose(out, ref, atol=1e-3, rtol=1e-3), f"max abs err {err}"

    print("KERNEL_OK")
</pallas_src>

<mosaic_0001>
module attributes {stable_mosaic.version = 11 : i64} {
  func.func private @main(%arg0: i32) attributes {dimension_semantics = [#tpu.dimension_semantics<core_parallel>], iteration_bounds = array<i64: 2>, tpu.core_type = #tpu.core_type<sc_scalar_subcore>, window_params = []} {
    return
  }
}

module attributes {stable_mosaic.version = 11 : i64} {
  func.func private @main(%arg0: i32) attributes {dimension_semantics = [#tpu.dimension_semantics<core_parallel>], iteration_bounds = array<i64: 2>, tpu.core_type = #tpu.core_type<sc_scalar_subcore>, window_params = []} {
    return
  }
}

module attributes {stable_mosaic.version = 11 : i64} {
  func.func @kernel(%arg0: i32, %arg1: memref<1x324xf32, #tpu.memory_space<vmem>>, %arg2: memref<1x4x324xf32, #tpu.memory_space<vmem>>, %arg3: memref<1x4x324xf32, #tpu.memory_space<vmem>>, %arg4: memref<8x72xf32, #tpu.memory_space<vmem>>, %arg5: memref<8x1xf32, #tpu.memory_space<vmem>>, %arg6: memref<1x8x324xf32, #tpu.memory_space<vmem>>, %arg7: memref<1x8x1xf32, #tpu.memory_space<vmem>>, %arg8: memref<1x8x1xf32, #tpu.memory_space<vmem>>, %arg9: memref<8x362xf32, #tpu.memory_space<vmem>>) attributes {dimension_semantics = [#tpu.dimension_semantics<parallel>], iteration_bounds = array<i64: 2>, scalar_prefetch = 0 : i64, scratch_operands = 1 : i64, tpu.core_type = #tpu.core_type<tc>, window_params = [{pipeline_mode = #tpu.pipeline_mode<synchronous>, transform_indices = @transform_0, window_bounds = array<i64: 1, 324>}, {transform_indices = @transform_1, window_bounds = array<i64: 1, 4, 324>}, {transform_indices = @transform_2, window_bounds = array<i64: 1, 4, 324>}, {pipeline_mode = #tpu.pipeline_mode<synchronous>, transform_indices = @transform_3, window_bounds = array<i64: 8, 72>}, {pipeline_mode = #tpu.pipeline_mode<synchronous>, transform_indices = @transform_4, window_bounds = array<i64: 8, 1>}, {transform_indices = @transform_5, window_bounds = array<i64: 1, 8, 324>}, {transform_indices = @transform_6, window_bounds = array<i64: 1, 8, 1>}, {transform_indices = @transform_7, window_bounds = array<i64: 1, 8, 1>}]} {
    %cst = arith.constant 0.000000e+00 : f32
    %0 = vector.broadcast %cst : f32 to vector<8x19xf32>
    %c0 = arith.constant 0 : index
    %c0_0 = arith.constant 0 : index
    %1 = vector.load %arg9[%c0, %c0_0] : memref<8x362xf32, #tpu.memory_space<vmem>>, vector<8x19xf32>
    tpu.vector_store %arg9[%c0, %c0_0], %0 {strides = array<i32>} : memref<8x362xf32, #tpu.memory_space<vmem>>, vector<8x19xf32>,
    %cst_1 = arith.constant 0.000000e+00 : f32
    %2 = vector.broadcast %cst_1 : f32 to vector<8x19xf32>
    %c0_2 = arith.constant 0 : index
    %c343 = arith.constant 343 : index
    %3 = vector.load %arg9[%c0_2, %c343] : memref<8x362xf32, #tpu.memory_space<vmem>>, vector<8x19xf32>
    tpu.vector_store %arg9[%c0_2, %c343], %2 {strides = array<i32>} : memref<8x362xf32, #tpu.memory_space<vmem>>, vector<8x19xf32>,
    %c0_3 = arith.constant 0 : index
    %c0_4 = arith.constant 0 : index
    %c0_5 = arith.constant 0 : index
    %4 = vector.load %arg2[%c0_3, %c0_4, %c0_5] : memref<1x4x324xf32, #tpu.memory_space<vmem>>, vector<1x4x324xf32>
    %5 = vector.shape_cast %4 : vector<1x4x324xf32> to vector<4x324xf32>
    %c0_6 = arith.constant 0 : index
    %c19 = arith.constant 19 : index
    %6 = vector.load %arg9[%c0_6, %c19] : memref<8x362xf32, #tpu.memory_space<vmem>>, vector<4x324xf32>
    tpu.vector_store %arg9[%c0_6, %c19], %5 {strides = array<i32>} : memref<8x362xf32, #tpu.memory_space<vmem>>, vector<4x324xf32>,
    %c0_7 = arith.constant 0 : index
    %c0_8 = arith.constant 0 : index
    %c0_9 = arith.constant 0 : index
    %7 = vector.load %arg3[%c0_7, %c0_8, %c0_9] : memref<1x4x324xf32, #tpu.memory_space<vmem>>, vector<1x4x324xf32>
    %8 = vector.shape_cast %7 : vector<1x4x324xf32> to vector<4x324xf32>
    %c4 = arith.constant 4 : index
    %c19_10 = arith.constant 19 : index
    %9 = vector.load %arg9[%c4, %c19_10] : memref<8x362xf32, #tpu.memory_space<vmem>>, vector<4x324xf32>
    tpu.vector_store %arg9[%c4, %c19_10], %8 {strides = array<i32>} : memref<8x362xf32, #tpu.memory_space<vmem>>, vector<4x324xf32>,
    %c0_11 = arith.constant 0 : index
    %c0_12 = arith.constant 0 : index
    %10 = vector.load %arg9[%c0_11, %c0_12] : memref<8x362xf32, #tpu.memory_space<vmem>>, vector<8x324xf32>
    %c0_13 = arith.constant 0 : index
    %c1 = arith.constant 1 : index
    %11 = vector.load %arg9[%c0_13, %c1] : memref<8x362xf32, #tpu.memory_space<vmem>>, vector<8x324xf32>
    %c0_14 = arith.constant 0 : index
    %c2 = arith.constant 2 : index
    %12 = vector.load %arg9[%c0_14, %c2] : memref<8x362xf32, #tpu.memory_space<vmem>>, vector<8x324xf32>
    %c0_15 = arith.constant 0 : index
    %c18 = arith.constant 18 : index
    %13 = vector.load %arg9[%c0_15, %c18] : memref<8x362xf32, #tpu.memory_space<vmem>>, vector<8x324xf32>
    %c0_16 = arith.constant 0 : index
    %c19_17 = arith.constant 19 : index
    %14 = vector.load %arg9[%c0_16, %c19_17] : memref<8x362xf32, #tpu.memory_space<vmem>>, vector<8x324xf32>
    %c0_18 = arith.constant 0 : index
    %c20 = arith.constant 20 : index
    %15 = vector.load %arg9[%c0_18, %c20] : memref<8x362xf32, #tpu.memory_space<vmem>>, vector<8x324xf32>
    %c0_19 = arith.constant 0 : index
    %c36 = arith.constant 36 : index
    %16 = vector.load %arg9[%c0_19, %c36] : memref<8x362xf32, #tpu.memory_space<vmem>>, vector<8x324xf32>
    %c0_20 = arith.constant 0 : index
    %c37 = arith.constant 37 : index
    %17 = vector.load %arg9[%c0_20, %c37] : memref<8x362xf32, #tpu.memory_space<vmem>>, vector<8x324xf32>
    %c0_21 = arith.constant 0 : index
    %c38 = arith.constant 38 : index
    %18 = vector.load %arg9[%c0_21, %c38] : memref<8x362xf32, #tpu.memory_space<vmem>>, vector<8x324xf32>
    %19 = tpu.concatenate %10, %11, %12, %13, %14, %15, %16, %17, %18 in 0 : vector<8x324xf32>, vector<8x324xf32>, vector<8x324xf32>, vector<8x324xf32>, vector<8x324xf32>, vector<8x324xf32>, vector<8x324xf32>, vector<8x324xf32>, vector<8x324xf32> -> vector<72x324xf32>
    %c0_22 = arith.constant 0 : index
    %c0_23 = arith.constant 0 : index
    %20 = vector.load %arg4[%c0_22, %c0_23] : memref<8x72xf32, #tpu.memory_space<vmem>>, vector<8x72xf32>
    %cst_24 = arith.constant dense<0.000000e+00> : vector<8x324xf32>
    %21 = tpu.matmul %20, %19, %cst_24 {dimension_numbers = #tpu.dot_dimension_numbers<[1], [0], [0], [1], [0, 0, 1, 1], [], []>} : vector<8x72xf32>, vector<72x324xf32>, vector<8x324xf32> -> vector<8x324xf32>
    %c0_25 = arith.constant 0 : index
    %c0_26 = arith.constant 0 : index
    %22 = vector.load %arg1[%c0_25, %c0_26] : memref<1x324xf32, #tpu.memory_space<vmem>>, vector<1x324xf32>
    %c0_27 = arith.constant 0 : index
    %c0_28 = arith.constant 0 : index
    %23 = vector.load %arg5[%c0_27, %c0_28] : memref<8x1xf32, #tpu.memory_space<vmem>>, vector<8x1xf32>
    %24 = vector.broadcast %23 : vector<8x1xf32> to vector<8x324xf32>
    %25 = arith.addf %21, %24 : vector<8x324xf32>
    %26 = vector.broadcast %22 : vector<1x324xf32> to vector<8x324xf32>
    %27 = arith.mulf %25, %26 : vector<8x324xf32>
    %28 = vector.shape_cast %27 : vector<8x324xf32> to vector<1x8x324xf32>
    %c0_29 = arith.constant 0 : index
    %c0_30 = arith.constant 0 : index
    %c0_31 = arith.constant 0 : index
    %29 = vector.load %arg6[%c0_29, %c0_30, %c0_31] : memref<1x8x324xf32, #tpu.memory_space<vmem>>, vector<1x8x324xf32>
    tpu.vector_store %arg6[%c0_29, %c0_30, %c0_31], %28 {strides = array<i32>} : memref<1x8x324xf32, #tpu.memory_space<vmem>>, vector<1x8x324xf32>,
    %cst_32 = arith.constant dense<0.000000e+00> : vector<8xf32>
    %30 = vector.multi_reduction <add>, %27, %cst_32 [1] : vector<8x324xf32> to vector<8xf32>
    %31 = vector.shape_cast %30 : vector<8xf32> to vector<8x1xf32>
    %cst_33 = arith.constant 3.906250e-03 : f32
    %32 = vector.broadcast %cst_33 : f32 to vector<8x1xf32>
    %33 = arith.mulf %31, %32 : vector<8x1xf32>
    %34 = vector.broadcast %33 : vector<8x1xf32> to vector<8x324xf32>
    %35 = arith.subf %27, %34 : vector<8x324xf32>
    %36 = vector.broadcast %22 : vector<1x324xf32> to vector<8x324xf32>
    %37 = arith.mulf %35, %36 : vector<8x324xf32>
    %38 = vector.shape_cast %31 : vector<8x1xf32> to vector<1x8x1xf32>
    %c0_34 = arith.constant 0 : index
    %c0_35 = arith.constant 0 : index
    %c0_36 = arith.constant 0 : index
    %39 = vector.load %arg7[%c0_34, %c0_35, %c0_36] : memref<1x8x1xf32, #tpu.memory_space<vmem>>, vector<1x8x1xf32>
    tpu.vector_store %arg7[%c0_34, %c0_35, %c0_36], %38 {strides = array<i32>} : memref<1x8x1xf32, #tpu.memory_space<vmem>>, vector<1x8x1xf32>,
    %40 = arith.mulf %37, %37 : vector<8x324xf32>
    %cst_37 = arith.constant dense<0.000000e+00> : vector<8xf32>
    %41 = vector.multi_reduction <add>, %40, %cst_37 [1] : vector<8x324xf32> to vector<8xf32>
    %42 = vector.shape_cast %41 : vector<8xf32> to vector<8x1xf32>
    %43 = vector.shape_cast %42 : vector<8x1xf32> to vector<1x8x1xf32>
    %c0_38 = arith.constant 0 : index
    %c0_39 = arith.constant 0 : index
    %c0_40 = arith.constant 0 : index
    %44 = vector.load %arg8[%c0_38, %c0_39, %c0_40] : memref<1x8x1xf32, #tpu.memory_space<vmem>>, vector<1x8x1xf32>
    tpu.vector_store %arg8[%c0_38, %c0_39, %c0_40], %43 {strides = array<i32>} : memref<1x8x1xf32, #tpu.memory_space<vmem>>, vector<1x8x1xf32>,
    return
  }
  func.func @transform_0(%arg0: i32) -> (i32, i32) {
    %c0_i32 = arith.constant 0 : i32
    %c0_i32_0 = arith.constant 0 : i32
    %c0_i32_1 = arith.constant 0 : i32
    return %c0_i32, %c0_i32_0 : i32, i32
  }
  func.func @transform_1(%arg0: i32) -> (i32, i32, i32) {
    %c0_i32 = arith.constant 0 : i32
    %c0_i32_0 = arith.constant 0 : i32
    %c0_i32_1 = arith.constant 0 : i32
    return %arg0, %c0_i32, %c0_i32_0 : i32, i32, i32
  }
  func.func @transform_2(%arg0: i32) -> (i32, i32, i32) {
    %c0_i32 = arith.constant 0 : i32
    %c0_i32_0 = arith.constant 0 : i32
    %c0_i32_1 = arith.constant 0 : i32
    return %arg0, %c0_i32, %c0_i32_0 : i32, i32, i32
  }
  func.func @transform_3(%arg0: i32) -> (i32, i32) {
    %c0_i32 = arith.constant 0 : i32
    %c0_i32_0 = arith.constant 0 : i32
    %c0_i32_1 = arith.constant 0 : i32
    return %c0_i32, %c0_i32_0 : i32, i32
  }
  func.func @transform_4(%arg0: i32) -> (i32, i32) {
    %c0_i32 = arith.constant 0 : i32
    %c0_i32_0 = arith.constant 0 : i32
    %c0_i32_1 = arith.constant 0 : i32
    return %c0_i32, %c0_i32_0 : i32, i32
  }
  func.func @transform_5(%arg0: i32) -> (i32, i32, i32) {
    %c0_i32 = arith.constant 0 : i32
    %c0_i32_0 = arith.constant 0 : i32
    %c0_i32_1 = arith.constant 0 : i32
    return %arg0, %c0_i32, %c0_i32_0 : i32, i32, i32
  }
  func.func @transform_6(%arg0: i32) -> (i32, i32, i32) {
    %c0_i32 = arith.constant 0 : i32
    %c0_i32_0 = arith.constant 0 : i32
    %c0_i32_1 = arith.constant 0 : i32
    return %arg0, %c0_i32, %c0_i32_0 : i32, i32, i32
  }
  func.func @transform_7(%arg0: i32) -> (i32, i32, i32) {
    %c0_i32 = arith.constant 0 : i32
    %c0_i32_0 = arith.constant 0 : i32
    %c0_i32_1 = arith.constant 0 : i32
    return %arg0, %c0_i32, %c0_i32_0 : i32, i32, i32
  }
}

module attributes {stable_mosaic.version = 11 : i64} {
  func.func @kernel(%arg0: i32, %arg1: memref<8x16xf32, #tpu.memory_space<vmem>>, %arg2: memref<16x8xf32, #tpu.memory_space<vmem>>, %arg3: memref<1x4x8x8xf32, #tpu.memory_space<vmem>>, %arg4: memref<1x4x18x18xf32, #tpu.memory_space<vmem>>) attributes {dimension_semantics = [#tpu.dimension_semantics<parallel>], iteration_bounds = array<i64: 2>, scalar_prefetch = 0 : i64, scratch_operands = 0 : i64, tpu.core_type = #tpu.core_type<tc>, window_params = [{pipeline_mode = #tpu.pipeline_mode<synchronous>, transform_indices = @transform_0, window_bounds = array<i64: 8, 16>}, {pipeline_mode = #tpu.pipeline_mode<synchronous>, transform_indices = @transform_1, window_bounds = array<i64: 16, 8>}, {transform_indices = @transform_2, window_bounds = array<i64: 1, 4, 8, 8>}, {transform_indices = @transform_3, window_bounds = array<i64: 1, 4, 18, 18>}]} {
    %cst = arith.constant 0.000000e+00 : f32
    %0 = vector.broadcast %cst : f32 to vector<1x4x18x18xf32>
    %c0 = arith.constant 0 : index
    %c0_0 = arith.constant 0 : index
    %c0_1 = arith.constant 0 : index
    %c0_2 = arith.constant 0 : index
    %1 = vector.load %arg4[%c0, %c0_0, %c0_1, %c0_2] : memref<1x4x18x18xf32, #tpu.memory_space<vmem>>, vector<1x4x18x18xf32>
    tpu.vector_store %arg4[%c0, %c0_0, %c0_1, %c0_2], %0 {strides = array<i32>} : memref<1x4x18x18xf32, #tpu.memory_space<vmem>>, vector<1x4x18x18xf32>,
    %c0_3 = arith.constant 0 : index
    %c0_4 = arith.constant 0 : index
    %c0_5 = arith.constant 0 : index
    %c0_6 = arith.constant 0 : index
    %2 = vector.load %arg3[%c0_3, %c0_4, %c0_5, %c0_6] : memref<1x4x8x8xf32, #tpu.memory_space<vmem>>, vector<1x4x8x8xf32>
    %3 = vector.shape_cast %2 : vector<1x4x8x8xf32> to vector<4x8x8xf32>
    %4 = vector.shape_cast %3 : vector<4x8x8xf32> to vector<32x8xf32>
    %c0_7 = arith.constant 0 : index
    %c0_8 = arith.constant 0 : index
    %5 = vector.load %arg1[%c0_7, %c0_8] : memref<8x16xf32, #tpu.memory_space<vmem>>, vector<8x16xf32>
    %cst_9 = arith.constant dense<0.000000e+00> : vector<32x16xf32>
    %6 = tpu.matmul %4, %5, %cst_9 {dimension_numbers = #tpu.dot_dimension_numbers<[1], [0], [0], [1], [0, 0, 1, 1], [], []>} : vector<32x8xf32>, vector<8x16xf32>, vector<32x16xf32> -> vector<32x16xf32>
    %7 = vector.shape_cast %6 : vector<32x16xf32> to vector<4x8x16xf32>
    %c0_10 = arith.constant 0 : index
    %c0_11 = arith.constant 0 : index
    %8 = vector.load %arg2[%c0_10, %c0_11] : memref<16x8xf32, #tpu.memory_space<vmem>>, vector<16x8xf32>
    %9 = vector.extract_strided_slice %7 {offsets = [0, 0, 0], sizes = [1, 8, 16], strides = [1, 1, 1]} : vector<4x8x16xf32> to vector<1x8x16xf32>
    %10 = vector.shape_cast %9 : vector<1x8x16xf32> to vector<8x16xf32>
    %cst_12 = arith.constant dense<0.000000e+00> : vector<16x16xf32>
    %11 = tpu.matmul %8, %10, %cst_12 {dimension_numbers = #tpu.dot_dimension_numbers<[1], [0], [0], [1], [0, 0, 1, 1], [], []>} : vector<16x8xf32>, vector<8x16xf32>, vector<16x16xf32> -> vector<16x16xf32>
    %c0_13 = arith.constant 0 : index
    %c0_14 = arith.constant 0 : index
    %c1 = arith.constant 1 : index
    %c1_15 = arith.constant 1 : index
    %12 = vector.load %arg4[%c0_13, %c0_14, %c1, %c1_15] : memref<1x4x18x18xf32, #tpu.memory_space<vmem>>, vector<1x1x16x16xf32>
    %13 = vector.shape_cast %12 : vector<1x1x16x16xf32> to vector<16x16xf32>
    %14 = vector.shape_cast %11 : vector<16x16xf32> to vector<1x1x16x16xf32>
    tpu.vector_store %arg4[%c0_13, %c0_14, %c1, %c1_15], %14 {strides = array<i32>} : memref<1x4x18x18xf32, #tpu.memory_space<vmem>>, vector<1x1x16x16xf32>,
    %15 = vector.extract_strided_slice %7 {offsets = [1, 0, 0], sizes = [1, 8, 16], strides = [1, 1, 1]} : vector<4x8x16xf32> to vector<1x8x16xf32>
    %16 = vector.shape_cast %15 : vector<1x8x16xf32> to vector<8x16xf32>
    %cst_16 = arith.constant dense<0.000000e+00> : vector<16x16xf32>
    %17 = tpu.matmul %8, %16, %cst_16 {dimension_numbers = #tpu.dot_dimension_numbers<[1], [0], [0], [1], [0, 0, 1, 1], [], []>} : vector<16x8xf32>, vector<8x16xf32>, vector<16x16xf32> -> vector<16x16xf32>
    %c0_17 = arith.constant 0 : index
    %c1_18 = arith.constant 1 : index
    %c1_19 = arith.constant 1 : index
    %c1_20 = arith.constant 1 : index
    %18 = vector.load %arg4[%c0_17, %c1_18, %c1_19, %c1_20] : memref<1x4x18x18xf32, #tpu.memory_space<vmem>>, vector<1x1x16x16xf32>
    %19 = vector.shape_cast %18 : vector<1x1x16x16xf32> to vector<16x16xf32>
    %20 = vector.shape_cast %17 : vector<16x16xf32> to vector<1x1x16x16xf32>
    tpu.vector_store %arg4[%c0_17, %c1_18, %c1_19, %c1_20], %20 {strides = array<i32>} : memref<1x4x18x18xf32, #tpu.memory_space<vmem>>, vector<1x1x16x16xf32>,
    %21 = vector.extract_strided_slice %7 {offsets = [2, 0, 0], sizes = [1, 8, 16], strides = [1, 1, 1]} : vector<4x8x16xf32> to vector<1x8x16xf32>
    %22 = vector.shape_cast %21 : vector<1x8x16xf32> to vector<8x16xf32>
    %cst_21 = arith.constant dense<0.000000e+00> : vector<16x16xf32>
    %23 = tpu.matmul %8, %22, %cst_21 {dimension_numbers = #tpu.dot_dimension_numbers<[1], [0], [0], [1], [0, 0, 1, 1], [], []>} : vector<16x8xf32>, vector<8x16xf32>, vector<16x16xf32> -> vector<16x16xf32>
    %c0_22 = arith.constant 0 : index
    %c2 = arith.constant 2 : index
    %c1_23 = arith.constant 1 : index
    %c1_24 = arith.constant 1 : index
    %24 = vector.load %arg4[%c0_22, %c2, %c1_23, %c1_24] : memref<1x4x18x18xf32, #tpu.memory_space<vmem>>, vector<1x1x16x16xf32>
    %25 = vector.shape_cast %24 : vector<1x1x16x16xf32> to vector<16x16xf32>
    %26 = vector.shape_cast %23 : vector<16x16xf32> to vector<1x1x16x16xf32>
    tpu.vector_store %arg4[%c0_22, %c2, %c1_23, %c1_24], %26 {strides = array<i32>} : memref<1x4x18x18xf32, #tpu.memory_space<vmem>>, vector<1x1x16x16xf32>,
    %27 = vector.extract_strided_slice %7 {offsets = [3, 0, 0], sizes = [1, 8, 16], strides = [1, 1, 1]} : vector<4x8x16xf32> to vector<1x8x16xf32>
    %28 = vector.shape_cast %27 : vector<1x8x16xf32> to vector<8x16xf32>
    %cst_25 = arith.constant dense<0.000000e+00> : vector<16x16xf32>
    %29 = tpu.matmul %8, %28, %cst_25 {dimension_numbers = #tpu.dot_dimension_numbers<[1], [0], [0], [1], [0, 0, 1, 1], [], []>} : vector<16x8xf32>, vector<8x16xf32>, vector<16x16xf32> -> vector<16x16xf32>
    %c0_26 = arith.constant 0 : index
    %c3 = arith.constant 3 : index
    %c1_27 = arith.constant 1 : index
    %c1_28 = arith.constant 1 : index
    %30 = vector.load %arg4[%c0_26, %c3, %c1_27, %c1_28] : memref<1x4x18x18xf32, #tpu.memory_space<vmem>>, vector<1x1x16x16xf32>
    %31 = vector.shape_cast %30 : vector<1x1x16x16xf32> to vector<16x16xf32>
    %32 = vector.shape_cast %29 : vector<16x16xf32> to vector<1x1x16x16xf32>
    tpu.vector_store %arg4[%c0_26, %c3, %c1_27, %c1_28], %32 {strides = array<i32>} : memref<1x4x18x18xf32, #tpu.memory_space<vmem>>, vector<1x1x16x16xf32>,
    return
  }
  func.func @transform_0(%arg0: i32) -> (i32, i32) {
    %c0_i32 = arith.constant 0 : i32
    %c0_i32_0 = arith.constant 0 : i32
    %c0_i32_1 = arith.constant 0 : i32
    return %c0_i32, %c0_i32_0 : i32, i32
  }
  func.func @transform_1(%arg0: i32) -> (i32, i32) {
    %c0_i32 = arith.constant 0 : i32
    %c0_i32_0 = arith.constant 0 : i32
    %c0_i32_1 = arith.constant 0 : i32
    return %c0_i32, %c0_i32_0 : i32, i32
  }
  func.func @transform_2(%arg0: i32) -> (i32, i32, i32, i32) {
    %c0_i32 = arith.constant 0 : i32
    %c0_i32_0 = arith.constant 0 : i32
    %c0_i32_1 = arith.constant 0 : i32
    %c0_i32_2 = arith.constant 0 : i32
    return %arg0, %c0_i32, %c0_i32_0, %c0_i32_1 : i32, i32, i32, i32
  }
  func.func @transform_3(%arg0: i32) -> (i32, i32, i32, i32) {
    %c0_i32 = arith.constant 0 : i32
    %c0_i32_0 = arith.constant 0 : i32
    %c0_i32_1 = arith.constant 0 : i32
    %c0_i32_2 = arith.constant 0 : i32
    return %arg0, %c0_i32, %c0_i32_0, %c0_i32_1 : i32, i32, i32, i32
  }
}

module attributes {stable_mosaic.version = 11 : i64} {
  func.func @_bn_relu_kernel(%arg0: i32, %arg1: memref<1x8x324xf32, #tpu.memory_space<vmem>>, %arg2: memref<8x1xf32, #tpu.memory_space<vmem>>, %arg3: memref<8x1xf32, #tpu.memory_space<vmem>>, %arg4: memref<1x324xf32, #tpu.memory_space<vmem>>, %arg5: memref<1x8x324xf32, #tpu.memory_space<vmem>>) attributes {dimension_semantics = [#tpu.dimension_semantics<parallel>], iteration_bounds = array<i64: 2>, scalar_prefetch = 0 : i64, scratch_operands = 0 : i64, tpu.core_type = #tpu.core_type<tc>, window_params = [{transform_indices = @transform_0, window_bounds = array<i64: 1, 8, 324>}, {pipeline_mode = #tpu.pipeline_mode<synchronous>, transform_indices = @transform_1, window_bounds = array<i64: 8, 1>}, {pipeline_mode = #tpu.pipeline_mode<synchronous>, transform_indices = @transform_2, window_bounds = array<i64: 8, 1>}, {pipeline_mode = #tpu.pipeline_mode<synchronous>, transform_indices = @transform_3, window_bounds = array<i64: 1, 324>}, {transform_indices = @transform_4, window_bounds = array<i64: 1, 8, 324>}]} {
    %c0 = arith.constant 0 : index
    %c0_0 = arith.constant 0 : index
    %c0_1 = arith.constant 0 : index
    %0 = vector.load %arg1[%c0, %c0_0, %c0_1] : memref<1x8x324xf32, #tpu.memory_space<vmem>>, vector<1x8x324xf32>
    %1 = vector.shape_cast %0 : vector<1x8x324xf32> to vector<8x324xf32>
    %c0_2 = arith.constant 0 : index
    %c0_3 = arith.constant 0 : index
    %2 = vector.load %arg2[%c0_2, %c0_3] : memref<8x1xf32, #tpu.memory_space<vmem>>, vector<8x1xf32>
    %3 = vector.broadcast %2 : vector<8x1xf32> to vector<8x324xf32>
    %4 = arith.mulf %1, %3 : vector<8x324xf32>
    %c0_4 = arith.constant 0 : index
    %c0_5 = arith.constant 0 : index
    %5 = vector.load %arg3[%c0_4, %c0_5] : memref<8x1xf32, #tpu.memory_space<vmem>>, vector<8x1xf32>
    %6 = vector.broadcast %5 : vector<8x1xf32> to vector<8x324xf32>
    %7 = arith.addf %4, %6 : vector<8x324xf32>
    %cst = arith.constant 0.000000e+00 : f32
    %8 = vector.broadcast %cst : f32 to vector<8x324xf32>
    %9 = arith.maximumf %7, %8 : vector<8x324xf32>
    %c0_6 = arith.constant 0 : index
    %c0_7 = arith.constant 0 : index
    %10 = vector.load %arg4[%c0_6, %c0_7] : memref<1x324xf32, #tpu.memory_space<vmem>>, vector<1x324xf32>
    %11 = vector.broadcast %10 : vector<1x324xf32> to vector<8x324xf32>
    %12 = arith.mulf %9, %11 : vector<8x324xf32>
    %13 = vector.shape_cast %12 : vector<8x324xf32> to vector<1x8x324xf32>
    %c0_8 = arith.constant 0 : index
    %c0_9 = arith.constant 0 : index
    %c0_10 = arith.constant 0 : index
    %14 = vector.load %arg5[%c0_8, %c0_9, %c0_10] : memref<1x8x324xf32, #tpu.memory_space<vmem>>, vector<1x8x324xf32>
    tpu.vector_store %arg5[%c0_8, %c0_9, %c0_10], %13 {strides = array<i32>} : memref<1x8x324xf32, #tpu.memory_space<vmem>>, vector<1x8x324xf32>,
    return
  }
  func.func @transform_0(%arg0: i32) -> (i32, i32, i32) {
    %c0_i32 = arith.constant 0 : i32
    %c0_i32_0 = arith.constant 0 : i32
    %c0_i32_1 = arith.constant 0 : i32
    return %arg0, %c0_i32, %c0_i32_0 : i32, i32, i32
  }
  func.func @transform_1(%arg0: i32) -> (i32, i32) {
    %c0_i32 = arith.constant 0 : i32
    %c0_i32_0 = arith.constant 0 : i32
    %c0_i32_1 = arith.constant 0 : i32
    return %c0_i32, %c0_i32_0 : i32, i32
  }
  func.func @transform_2(%arg0: i32) -> (i32, i32) {
    %c0_i32 = arith.constant 0 : i32
    %c0_i32_0 = arith.constant 0 : i32
    %c0_i32_1 = arith.constant 0 : i32
    return %c0_i32, %c0_i32_0 : i32, i32
  }
  func.func @transform_3(%arg0: i32) -> (i32, i32) {
    %c0_i32 = arith.constant 0 : i32
    %c0_i32_0 = arith.constant 0 : i32
    %c0_i32_1 = arith.constant 0 : i32
    return %c0_i32, %c0_i32_0 : i32, i32
  }
  func.func @transform_4(%arg0: i32) -> (i32, i32, i32) {
    %c0_i32 = arith.constant 0 : i32
    %c0_i32_0 = arith.constant 0 : i32
    %c0_i32_1 = arith.constant 0 : i32
    return %arg0, %c0_i32, %c0_i32_0 : i32, i32, i32
  }
}

module attributes {stable_mosaic.version = 11 : i64} {
  func.func @kernel(%arg0: i32, %arg1: memref<1x324xf32, #tpu.memory_space<vmem>>, %arg2: memref<1x8x324xf32, #tpu.memory_space<vmem>>, %arg3: memref<8x72xf32, #tpu.memory_space<vmem>>, %arg4: memref<8x1xf32, #tpu.memory_space<vmem>>, %arg5: memref<1x8x324xf32, #tpu.memory_space<vmem>>, %arg6: memref<1x8x1xf32, #tpu.memory_space<vmem>>, %arg7: memref<1x8x1xf32, #tpu.memory_space<vmem>>, %arg8: memref<8x362xf32, #tpu.memory_space<vmem>>) attributes {dimension_semantics = [#tpu.dimension_semantics<parallel>], iteration_bounds = array<i64: 2>, scalar_prefetch = 0 : i64, scratch_operands = 1 : i64, tpu.core_type = #tpu.core_type<tc>, window_params = [{pipeline_mode = #tpu.pipeline_mode<synchronous>, transform_indices = @transform_0, window_bounds = array<i64: 1, 324>}, {transform_indices = @transform_1, window_bounds = array<i64: 1, 8, 324>}, {pipeline_mode = #tpu.pipeline_mode<synchronous>, transform_indices = @transform_2, window_bounds = array<i64: 8, 72>}, {pipeline_mode = #tpu.pipeline_mode<synchronous>, transform_indices = @transform_3, window_bounds = array<i64: 8, 1>}, {transform_indices = @transform_4, window_bounds = array<i64: 1, 8, 324>}, {transform_indices = @transform_5, window_bounds = array<i64: 1, 8, 1>}, {transform_indices = @transform_6, window_bounds = array<i64: 1, 8, 1>}]} {
    %cst = arith.constant 0.000000e+00 : f32
    %0 = vector.broadcast %cst : f32 to vector<8x19xf32>
    %c0 = arith.constant 0 : index
    %c0_0 = arith.constant 0 : index
    %1 = vector.load %arg8[%c0, %c0_0] : memref<8x362xf32, #tpu.memory_space<vmem>>, vector<8x19xf32>
    tpu.vector_store %arg8[%c0, %c0_0], %0 {strides = array<i32>} : memref<8x362xf32, #tpu.memory_space<vmem>>, vector<8x19xf32>,
    %cst_1 = arith.constant 0.000000e+00 : f32
    %2 = vector.broadcast %cst_1 : f32 to vector<8x19xf32>
    %c0_2 = arith.constant 0 : index
    %c343 = arith.constant 343 : index
    %3 = vector.load %arg8[%c0_2, %c343] : memref<8x362xf32, #tpu.memory_space<vmem>>, vector<8x19xf32>
    tpu.vector_store %arg8[%c0_2, %c343], %2 {strides = array<i32>} : memref<8x362xf32, #tpu.memory_space<vmem>>, vector<8x19xf32>,
    %c0_3 = arith.constant 0 : index
    %c0_4 = arith.constant 0 : index
    %c0_5 = arith.constant 0 : index
    %4 = vector.load %arg2[%c0_3, %c0_4, %c0_5] : memref<1x8x324xf32, #tpu.memory_space<vmem>>, vector<1x8x324xf32>
    %5 = vector.shape_cast %4 : vector<1x8x324xf32> to vector<8x324xf32>
    %c0_6 = arith.constant 0 : index
    %c19 = arith.constant 19 : index
    %6 = vector.load %arg8[%c0_6, %c19] : memref<8x362xf32, #tpu.memory_space<vmem>>, vector<8x324xf32>
    tpu.vector_store %arg8[%c0_6, %c19], %5 {strides = array<i32>} : memref<8x362xf32, #tpu.memory_space<vmem>>, vector<8x324xf32>,
    %c0_7 = arith.constant 0 : index
    %c0_8 = arith.constant 0 : index
    %7 = vector.load %arg8[%c0_7, %c0_8] : memref<8x362xf32, #tpu.memory_space<vmem>>, vector<8x324xf32>
    %c0_9 = arith.constant 0 : index
    %c1 = arith.constant 1 : index
    %8 = vector.load %arg8[%c0_9, %c1] : memref<8x362xf32, #tpu.memory_space<vmem>>, vector<8x324xf32>
    %c0_10 = arith.constant 0 : index
    %c2 = arith.constant 2 : index
    %9 = vector.load %arg8[%c0_10, %c2] : memref<8x362xf32, #tpu.memory_space<vmem>>, vector<8x324xf32>
    %c0_11 = arith.constant 0 : index
    %c18 = arith.constant 18 : index
    %10 = vector.load %arg8[%c0_11, %c18] : memref<8x362xf32, #tpu.memory_space<vmem>>, vector<8x324xf32>
    %c0_12 = arith.constant 0 : index
    %c19_13 = arith.constant 19 : index
    %11 = vector.load %arg8[%c0_12, %c19_13] : memref<8x362xf32, #tpu.memory_space<vmem>>, vector<8x324xf32>
    %c0_14 = arith.constant 0 : index
    %c20 = arith.constant 20 : index
    %12 = vector.load %arg8[%c0_14, %c20] : memref<8x362xf32, #tpu.memory_space<vmem>>, vector<8x324xf32>
    %c0_15 = arith.constant 0 : index
    %c36 = arith.constant 36 : index
    %13 = vector.load %arg8[%c0_15, %c36] : memref<8x362xf32, #tpu.memory_space<vmem>>, vector<8x324xf32>
    %c0_16 = arith.constant 0 : index
    %c37 = arith.constant 37 : index
    %14 = vector.load %arg8[%c0_16, %c37] : memref<8x362xf32, #tpu.memory_space<vmem>>, vector<8x324xf32>
    %c0_17 = arith.constant 0 : index
    %c38 = arith.constant 38 : index
    %15 = vector.load %arg8[%c0_17, %c38] : memref<8x362xf32, #tpu.memory_space<vmem>>, vector<8x324xf32>
    %16 = tpu.concatenate %7, %8, %9, %10, %11, %12, %13, %14, %15 in 0 : vector<8x324xf32>, vector<8x324xf32>, vector<8x324xf32>, vector<8x324xf32>, vector<8x324xf32>, vector<8x324xf32>, vector<8x324xf32>, vector<8x324xf32>, vector<8x324xf32> -> vector<72x324xf32>
    %c0_18 = arith.constant 0 : index
    %c0_19 = arith.constant 0 : index
    %17 = vector.load %arg3[%c0_18, %c0_19] : memref<8x72xf32, #tpu.memory_space<vmem>>, vector<8x72xf32>
    %cst_20 = arith.constant dense<0.000000e+00> : vector<8x324xf32>
    %18 = tpu.matmul %17, %16, %cst_20 {dimension_numbers = #tpu.dot_dimension_numbers<[1], [0], [0], [1], [0, 0, 1, 1], [], []>} : vector<8x72xf32>, vector<72x324xf32>, vector<8x324xf32> -> vector<8x324xf32>
    %c0_21 = arith.constant 0 : index
    %c0_22 = arith.constant 0 : index
    %19 = vector.load %arg1[%c0_21, %c0_22] : memref<1x324xf32, #tpu.memory_space<vmem>>, vector<1x324xf32>
    %c0_23 = arith.constant 0 : index
    %c0_24 = arith.constant 0 : index
    %20 = vector.load %arg4[%c0_23, %c0_24] : memref<8x1xf32, #tpu.memory_space<vmem>>, vector<8x1xf32>
    %21 = vector.broadcast %20 : vector<8x1xf32> to vector<8x324xf32>
    %22 = arith.addf %18, %21 : vector<8x324xf32>
    %23 = vector.broadcast %19 : vector<1x324xf32> to vector<8x324xf32>
    %24 = arith.mulf %22, %23 : vector<8x324xf32>
    %25 = vector.shape_cast %24 : vector<8x324xf32> to vector<1x8x324xf32>
    %c0_25 = arith.constant 0 : index
    %c0_26 = arith.constant 0 : index
    %c0_27 = arith.constant 0 : index
    %26 = vector.load %arg5[%c0_25, %c0_26, %c0_27] : memref<1x8x324xf32, #tpu.memory_space<vmem>>, vector<1x8x324xf32>
    tpu.vector_store %arg5[%c0_25, %c0_26, %c0_27], %25 {strides = array<i32>} : memref<1x8x324xf32, #tpu.memory_space<vmem>>, vector<1x8x324xf32>,
    %cst_28 = arith.constant dense<0.000000e+00> : vector<8xf32>
    %27 = vector.multi_reduction <add>, %24, %cst_28 [1] : vector<8x324xf32> to vector<8xf32>
    %28 = vector.shape_cast %27 : vector<8xf32> to vector<8x1xf32>
    %cst_29 = arith.constant 3.906250e-03 : f32
    %29 = vector.broadcast %cst_29 : f32 to vector<8x1xf32>
    %30 = arith.mulf %28, %29 : vector<8x1xf32>
    %31 = vector.broadcast %30 : vector<8x1xf32> to vector<8x324xf32>
    %32 = arith.subf %24, %31 : vector<8x324xf32>
    %33 = vector.broadcast %19 : vector<1x324xf32> to vector<8x324xf32>
    %34 = arith.mulf %32, %33 : vector<8x324xf32>
    %35 = vector.shape_cast %28 : vector<8x1xf32> to vector<1x8x1xf32>
    %c0_30 = arith.constant 0 : index
    %c0_31 = arith.constant 0 : index
    %c0_32 = arith.constant 0 : index
    %36 = vector.load %arg6[%c0_30, %c0_31, %c0_32] : memref<1x8x1xf32, #tpu.memory_space<vmem>>, vector<1x8x1xf32>
    tpu.vector_store %arg6[%c0_30, %c0_31, %c0_32], %35 {strides = array<i32>} : memref<1x8x1xf32, #tpu.memory_space<vmem>>, vector<1x8x1xf32>,
    %37 = arith.mulf %34, %34 : vector<8x324xf32>
    %cst_33 = arith.constant dense<0.000000e+00> : vector<8xf32>
    %38 = vector.multi_reduction <add>, %37, %cst_33 [1] : vector<8x324xf32> to vector<8xf32>
    %39 = vector.shape_cast %38 : vector<8xf32> to vector<8x1xf32>
    %40 = vector.shape_cast %39 : vector<8x1xf32> to vector<1x8x1xf32>
    %c0_34 = arith.constant 0 : index
    %c0_35 = arith.constant 0 : index
    %c0_36 = arith.constant 0 : index
    %41 = vector.load %arg7[%c0_34, %c0_35, %c0_36] : memref<1x8x1xf32, #tpu.memory_space<vmem>>, vector<1x8x1xf32>
    tpu.vector_store %arg7[%c0_34, %c0_35, %c0_36], %40 {strides = array<i32>} : memref<1x8x1xf32, #tpu.memory_space<vmem>>, vector<1x8x1xf32>,
    return
  }
  func.func @transform_0(%arg0: i32) -> (i32, i32) {
    %c0_i32 = arith.constant 0 : i32
    %c0_i32_0 = arith.constant 0 : i32
    %c0_i32_1 = arith.constant 0 : i32
    return %c0_i32, %c0_i32_0 : i32, i32
  }
  func.func @transform_1(%arg0: i32) -> (i32, i32, i32) {
    %c0_i32 = arith.constant 0 : i32
    %c0_i32_0 = arith.constant 0 : i32
    %c0_i32_1 = arith.constant 0 : i32
    return %arg0, %c0_i32, %c0_i32_0 : i32, i32, i32
  }
  func.func @transform_2(%arg0: i32) -> (i32, i32) {
    %c0_i32 = arith.constant 0 : i32
    %c0_i32_0 = arith.constant 0 : i32
    %c0_i32_1 = arith.constant 0 : i32
    return %c0_i32, %c0_i32_0 : i32, i32
  }
  func.func @transform_3(%arg0: i32) -> (i32, i32) {
    %c0_i32 = arith.constant 0 : i32
    %c0_i32_0 = arith.constant 0 : i32
    %c0_i32_1 = arith.constant 0 : i32
    return %c0_i32, %c0_i32_0 : i32, i32
  }
  func.func @transform_4(%arg0: i32) -> (i32, i32, i32) {
    %c0_i32 = arith.constant 0 : i32
    %c0_i32_0 = arith.constant 0 : i32
    %c0_i32_1 = arith.constant 0 : i32
    return %arg0, %c0_i32, %c0_i32_0 : i32, i32, i32
  }
  func.func @transform_5(%arg0: i32) -> (i32, i32, i32) {
    %c0_i32 = arith.constant 0 : i32
    %c0_i32_0 = arith.constant 0 : i32
    %c0_i32_1 = arith.constant 0 : i32
    return %arg0, %c0_i32, %c0_i32_0 : i32, i32, i32
  }
  func.func @transform_6(%arg0: i32) -> (i32, i32, i32) {
    %c0_i32 = arith.constant 0 : i32
    %c0_i32_0 = arith.constant 0 : i32
    %c0_i32_1 = arith.constant 0 : i32
    return %arg0, %c0_i32, %c0_i32_0 : i32, i32, i32
  }
}

</mosaic_0001>

<bundles_post_ra>
// kernel: up_forward.6
= control target key start
LH: loop header
LB: loop body
LE: loop exit
PB: predicated region body
PF: predicated region fallthrough
CT: control target
= control target key end

     0   :  { %s994_s24 = smov 0   ;;  %s1073_s0 = inlined_call_operand.vmem [shape: f32[1,324], index: 0, kind: input, shape index: {}]   ;;  %s1074_s1 = inlined_call_operand.vmem [shape: f32[2,4,324], index: 1, kind: input, shape index: {}]   ;;  %s1075_s2 = inlined_call_operand.vmem [shape: f32[2,4,324], index: 2, kind: input, shape index: {}]   ;;  %s1076_s3 = inlined_call_operand.vmem [shape: f32[8,72], index: 3, kind: input, shape index: {}]   ;;  %s1077_s4 = inlined_call_operand.vmem [shape: f32[8,1], index: 4, kind: input, shape index: {}]   ;;  %s1078_s5 = inlined_call_operand.vmem [shape: f32[2,8,324], index: 5, kind: output, shape index: {0}]   ;;  %s1079_s6 = inlined_call_operand.vmem [shape: f32[2,8,1], index: 6, kind: output, shape index: {1}]   ;;  %s1080_s7 = inlined_call_operand.vmem [shape: f32[2,8,1], index: 7, kind: output, shape index: {2}]  }
   0x1 LB: > { %s797_s25 = sadd.s32 4294967295, %s939_s24   ;;  %p801_p0 = scmp.ge.s32.totalorder %s939_s24, 1  ;;  %s939_s24 = sphi %s994_s24, %s18_s24  }
   0x2   : > { %p252_p1 = scmp.lt.s32.totalorder %s939_s24, 3 }
   0x4   : > { %p253_p2 = pnand %p801_p0, %p252_p1 }
   0x5   : > { %p297_p3 = scmp.lt.s32.totalorder (!%p253_p2), %s797_s25, 1  ;;  %vm320_vm0 = vcmask (!%p253_p2), 154624   ;;  %v941_v0 = vmov (!%p253_p2), 0.0   ;;  %vm322_vm1 = vcmask (!%p253_p2), 868024   ;;  %s942_s10 = smov (!%p253_p2), 19   ;;  %vm340_vm2 = vcmask (!%p253_p2), 1043608  }
   0x6   : > { %256 = sbr.rel (%p253_p2) target bundleno = 813 (0x32d), region = 40  ;;  %321 = vst.msk [vmem:[#allocation2] sm:$0xff] (!%p253_p2), %vm320_vm0, %v941_v0  ;;  %545 = vmatprep.mubr.f32.mxu0 (!%p253_p2), %v941_v0  ;;  %vm362_vm3 = vcmask (!%p253_p2), 1047708   ;;  %vm343_vm4 = vcmask (!%p253_p2), 707584   ;;  %vm365_vm5 = vcmask (!%p253_p2), 711684   ;;  %s943_s11 = smov (!%p253_p2), 127  }
   0x7   : > { %323 = vst.msk [vmem:[#allocation2 + $0x10] sm:$0xff] (!%p253_p2), %vm322_vm1, %v941_v0  ;;  %s944_s12 = smov (!%p253_p2), 126   ;;  %v945_v18 = vmov (!%p253_p2), 0.0|0.0   ;;  %s946_s13 = smov (!%p253_p2), 110   ;;  %vm951_vm6 = vmmov (!%p253_p2), 0   ;;  %v952_v22 = vmov (!%p253_p2), 0  }
   0x8   : > { %858 = vmatprep.subr.bf16.mxu1 (!%p253_p2), %v945_v18  ;;  %s947_s14 = smov (!%p253_p2), 109   ;;  %s948_s15 = smov (!%p253_p2), 108   ;;  %839 = vmatprep.mubr.msk.f32.mxu1 (!%p253_p2), %vm951_vm6, %v941_v0  ;;  %v471_v23 = vld [vmem:[%s1077_s4] sm:$0xff] (!%p253_p2)  ;;  %vm379_vm7 = vcmask (!%p253_p2), 1039360   ;;  %vm403_vm8 = vcmask (!%p253_p2), 900096   ;;  %vm391_vm9 = vcmask (!%p253_p2), 1031168  }
   0x9   : > { %s949_s16 = smov (!%p253_p2), 92   ;;  %s950_s17 = smov (!%p253_p2), 91   ;;  %928 = vset.pattern.permute.xlu1 (!%p253_p2), %v952_v22  ;;  %929 = vset.pattern.permute.xlu0 (!%p253_p2), %v952_v22  ;;  %vm427_vm10 = vcmask (!%p253_p2), 883712   ;;  %vm415_vm11 = vcmask (!%p253_p2), 891904   ;;  %vm451_vm12 = vcmask (!%p253_p2), 744448   ;;  %vm439_vm13 = vcmask (!%p253_p2), 752640  }
   0xa   : > { %s953_s18 = smov (!%p253_p2), 90   ;;  %vm463_vm14 = vcmask (!%p253_p2), 736256   ;;  %vm477_vm15 = vcmask (!%p253_p2), 588800   ;;  %vm657_vm1 = vcmask (!%p253_p2), 7168  }
   0xd   : > { %s1082_s25 = smov (!%p297_p3, %s797_s25), 1 }
   0xe   : > { %s870_s26 = smul.u32 12, %s1082_s25  ;;  %s805_s8 = sshll.u32 %s1082_s25, 3 }
   0xf   : > { %s871_s27 = smul.u32 24, %s1082_s25 }
  0x10   : > { %s301_s29 = scalar_lea.vmem %s1074_s1, %s870_s26  ;;  %s306_s9 = scalar_lea.vmem %s1075_s2, %s870_s26 }
  0x11   : > { %v325_v1 = vld [vmem:[%s301_s29 + $0x8] sm:$0xf]  ;;  %v324_v2 = vld [vmem:[%s301_s29] sm:$0xff]  ;;  %s311_s30 = scalar_lea.vmem %s1078_s5, %s871_s27 }
  0x12   : > { %v345_v3 = vld [vmem:[%s306_s9] sm:$0xff]  ;;  %333 = vrot.lane.b32.xlu1 %v325_v1, %s942_s10  ;;  %329 = vrot.lane.b32.xlu0 %v324_v2, %s942_s10  ;;  %v328_v4 = vcombine.high %v324_v2, %v324_v2  ;;  %v932_v6 = vld [vmem:[%s306_s9 + $0x8] ss:$0 sps:$4 sm:$0xff]  }
  0x13   : > { %v349_v5 = vcombine.low %v345_v3, %v345_v3 }
  0x16   : > { %351 = vrot.lane.b32.xlu1 %v349_v5, %s942_s10  ;;  %331 = vrot.lane.b32.xlu0 %v328_v4, %s942_s10 }
  0x1a   : > { %355 = vrot.lane.b32.xlu1 %v932_v6, %s942_s10  ;;  %353 = vrot.lane.b32.xlu0 %v345_v3, %s942_s10 }
  0x84   : > { %v334_v7 = vpop.permute.xlu1 %333  ;;  %v330_v8 = vpop.permute.xlu0 %329 }
  0x85   : > { %341 = vst.msk [vmem:[#allocation2] sm:$0xf] %vm340_vm2, %v330_v8 }
  0x88   : > { %v352_v9 = vpop.permute.xlu1 %351  ;;  %v332_v10 = vpop.permute.xlu0 %331 }
  0x89   : > { %363 = vst.msk [vmem:[#allocation2] sm:$0xf0] %vm362_vm3, %v352_v9  ;;  %v335_v11 = vsel %vm320_vm0, %v330_v8, %v332_v10  ;;  %v336_v12 = vsel %vm320_vm0, %v332_v10, %v334_v7 }
  0x8a   : > { %342 = vst [vmem:[#allocation2 + $0x8] sm:$0xf] %v335_v11  ;;  %344 = vst.msk [vmem:[#allocation2 + $0x10] sm:$0xf] %vm343_vm4, %v336_v12 }
  0x8c   : > { %v356_v13 = vpop.permute.xlu1 %355  ;;  %v354_v14 = vpop.permute.xlu0 %353 }
  0x8d   : > { %v357_v15 = vsel %vm320_vm0, %v352_v9, %v354_v14  ;;  %v358_v16 = vsel %vm320_vm0, %v354_v14, %v356_v13  ;;  %vm643_vm0 = vcmask 556032  }
  0x8e   : > { %364 = vst [vmem:[#allocation2 + $0x8] sm:$0xf0] %v357_v15  ;;  %366 = vst.msk [vmem:[#allocation2 + $0x10] sm:$0xf0] %vm365_vm5, %v358_v16 }
  0x90   : > { %v1019_v17 = vld [vmem:[#allocation2] sm:$0xff] }
  0x91   : > { %373 = vrot.lane.b32.xlu1 %v1019_v17, %s943_s11  ;;  %385 = vrot.lane.b32.xlu0 %v1019_v17, %s944_s12 }
  0x95   : > { %397 = vrot.lane.b32.xlu1 %v1019_v17, %s946_s13  ;;  %409 = vrot.lane.b32.xlu0 %v1019_v17, %s947_s14  ;;  %v368_v19 = vld [vmem:[#allocation2 + $0x8] sm:$0xff]  ;;  %v369_v20 = vld [vmem:[#allocation2 + $0x10] sm:$0xff] }
  0x96   : > { %v903_v21 = vpack.i.bf16 %v369_v20, %v368_v19 }
  0x99   : > { %421 = vrot.lane.b32.xlu1 %v1019_v17, %s948_s15  ;;  %433 = vrot.lane.b32.xlu0 %v1019_v17, %s949_s16 }
  0x9d   : > { %904 = vrot.lane.b32.xlu1 %v903_v21, %s946_s13  ;;  %894 = vrot.lane.b32.xlu0 %v903_v21, %s943_s11  ;;  %s315_s11 = scalar_lea.vmem %s1079_s6, %s805_s8  ;;  %s319_s13 = scalar_lea.vmem %s1080_s7, %s805_s8 }
  0xa1   : > { %914 = vrot.lane.b32.xlu1 %v903_v21, %s948_s15  ;;  %899 = vrot.lane.b32.xlu0 %v903_v21, %s944_s12 }
  0xa5   : > { %924 = vrot.lane.b32.xlu1 %v903_v21, %s950_s17  ;;  %909 = vrot.lane.b32.xlu0 %v903_v21, %s947_s14 }
  0xa9   : > { %445 = vrot.lane.b32.xlu1 %v1019_v17, %s950_s17  ;;  %919 = vrot.lane.b32.xlu0 %v903_v21, %s949_s16  ;;  %v623_v21 = vlaneseq }
  0xab   : > { %v624_v22 = vshrl.u32 %v623_v21, 7 }
  0xad   : > { %461 = vrot.lane.b32.xlu1 %v369_v20, %s953_s18  ;;  %459 = vrot.lane.b32.xlu0 %v368_v19, %s953_s18 }
  0xb1   : > { %457 = vrot.lane.b32.xlu0 %v1019_v17, %s953_s18  ;;  %474 = vperm.xlu1 %928, %v471_v23   ;;  %v633_v23 = vsub.s32 2, %v624_v22 }
 0x103   : > { %v374_v24 = vpop.permute.xlu1 %373  ;;  %v386_v25 = vpop.permute.xlu0 %385 }
 0x107   : > { %v398_v26 = vpop.permute.xlu1 %397  ;;  %v410_v27 = vpop.permute.xlu0 %409 }
 0x10b   : > { %v422_v28 = vpop.permute.xlu1 %421  ;;  %v1034_v29 = vpop.permute.xlu0 %433 }
 0x10f   : > { %v905_v30 = vpop.permute.xlu1 %904  ;;  %v895_v31 = vpop.permute.xlu0 %894 }
 0x110   : > { %v897_v32 = vunpack.i.h.bf16 %v895_v31  ;;  %v896_v33 = vunpack.i.l.bf16 %v895_v31  ;;  %v907_v34 = vunpack.i.h.bf16 %v905_v30  ;;  %v906_v35 = vunpack.i.l.bf16 %v905_v30 }
 0x112   : > { %v859_v36 = vpack.c.bf16 %v897_v32, %v369_v20  ;;  %v381_v37 = vsel %vm379_vm7, %v896_v33, %v897_v32  ;;  %v380_v38 = vsel %vm379_vm7, %v374_v24, %v896_v33  ;;  %v405_v47 = vsel %vm403_vm8, %v906_v35, %v907_v34 }
 0x113   : > { %v915_v39 = vpop.permute.xlu1 %914  ;;  %v900_v40 = vpop.permute.xlu0 %899  ;;  %v842_v41 = vpack.c.bf16 %v381_v37, %v368_v19  ;;  %v844_v42 = vpack.c.bf16 %v380_v38, %v1019_v17  ;;  %v404_v51 = vsel %vm403_vm8, %v398_v26, %v906_v35  ;;  %v625_v24 = vsub.s32 0, %v624_v22 }
 0x114   : > { %v902_v43 = vunpack.i.h.bf16 %v900_v40  ;;  %v901_v44 = vunpack.i.l.bf16 %v900_v40  ;;  %860 = vmatpush3.bf16.msra.mxu1 %v859_v36  ;;  %v917_v45 = vunpack.i.h.bf16 %v915_v39  ;;  %v916_v46 = vunpack.i.l.bf16 %v915_v39 }
 0x115   : > { %843 = vmatprep.subr.bf16.mxu0 %v842_v41  ;;  %861 = vmatprep.subr.bf16.mxu1 %v945_v18  ;;  %v629_v26 = vsub.s32 1, %v624_v22 }
 0x116   : > { %v862_v48 = vpack.c.bf16 %v907_v34, %v902_v43  ;;  %845 = vmatpush1.bf16.msra.mxu0 %v844_v42  ;;  %v393_v49 = vsel %vm391_vm9, %v901_v44, %v902_v43  ;;  %v392_v50 = vsel %vm391_vm9, %v386_v25, %v901_v44  ;;  %v429_v60 = vsel %vm427_vm10, %v916_v46, %v917_v45 }
 0x117   : > { %v925_v52 = vpop.permute.xlu1 %924  ;;  %v910_v53 = vpop.permute.xlu0 %909  ;;  %v846_v54 = vpack.c.bf16 %v405_v47, %v393_v49  ;;  %v848_v55 = vpack.c.bf16 %v404_v51, %v392_v50  ;;  %v428_v1 = vsel %vm427_vm10, %v422_v28, %v916_v46 }
 0x118   : > { %v912_v56 = vunpack.i.h.bf16 %v910_v53  ;;  %v911_v57 = vunpack.i.l.bf16 %v910_v53  ;;  %863 = vmatpush3.bf16.msra.mxu1 %v862_v48  ;;  %v927_v58 = vunpack.i.h.bf16 %v925_v52  ;;  %v926_v59 = vunpack.i.l.bf16 %v925_v52 }
 0x119   : > { %847 = vmatprep.subr.bf16.mxu0 %v846_v54  ;;  %864 = vmatprep.subr.bf16.mxu1 %v945_v18 }
 0x11a   : > { %v865_v61 = vpack.c.bf16 %v917_v45, %v912_v56  ;;  %849 = vmatpush1.bf16.msra.mxu0 %v848_v55  ;;  %v417_v62 = vsel %vm415_vm11, %v911_v57, %v912_v56  ;;  %v416_v63 = vsel %vm415_vm11, %v410_v27, %v911_v57  ;;  %v453_v8 = vsel %vm451_vm12, %v926_v59, %v927_v58 }
 0x11b   : > { %v446_v2 = vpop.permute.xlu1 %445  ;;  %v920_v3 = vpop.permute.xlu0 %919  ;;  %v850_v4 = vpack.c.bf16 %v429_v60, %v417_v62  ;;  %v852_v5 = vpack.c.bf16 %v428_v1, %v416_v63 }
 0x11c   : > { %v922_v6 = vunpack.i.h.bf16 %v920_v3  ;;  %v921_v7 = vunpack.i.l.bf16 %v920_v3  ;;  %866 = vmatpush3.bf16.msra.mxu1 %v865_v61  ;;  %v452_v9 = vsel %vm451_vm12, %v446_v2, %v926_v59 }
 0x11d   : > { %851 = vmatprep.subr.bf16.mxu0 %v850_v4  ;;  %867 = vmatprep.subr.bf16.mxu1 %v945_v18  ;;  %v469_v18 = vld [vmem:[%s1076_s3] sm:$0xff] }
 0x11e   : > { %v868_v10 = vpack.c.bf16 %v927_v58, %v922_v6  ;;  %853 = vmatpush1.bf16.msra.mxu0 %v852_v5  ;;  %v441_v11 = vsel %vm439_vm13, %v921_v7, %v922_v6  ;;  %v440_v12 = vsel %vm439_vm13, %v1034_v29, %v921_v7 }
 0x11f   : > { %v462_v13 = vpop.permute.xlu1 %461  ;;  %v460_v14 = vpop.permute.xlu0 %459  ;;  %v854_v15 = vpack.c.bf16 %v453_v8, %v441_v11  ;;  %v856_v16 = vpack.c.bf16 %v452_v9, %v440_v12 }
 0x120   : > { %869 = vmatpush3.bf16.msra.mxu1 %v868_v10  ;;  %v465_v17 = vsel %vm463_vm14, %v460_v14, %v462_v13 }
 0x121   : > { %855 = vmatprep.subr.bf16.mxu0 %v854_v15  ;;  %837 = vmatprep.subr.mxu1 %v941_v0  ;;  %v470_v0 = vld [vmem:[%s1073_s0] sm:$0x7] }
 0x122   : > { %857 = vmatpush1.bf16.msra.mxu0 %v856_v16  ;;  %v634_v27 = vrot.slane %v470_v0, %v633_v23  ;;  %v626_v29 = vrot.slane %v470_v0, %v625_v24  ;;  %v630_v33 = vrot.slane %v470_v0, %v629_v26 }
 0x123   : > { %v458_v19 = vpop.permute.xlu0 %457  ;;  %497 = vmatprep.subr.mxu0 %v465_v17 }
 0x124   : > { %838 = vmatpush3.msra.mxu1 %v462_v13  ;;  %v464_v20 = vsel %vm463_vm14, %v458_v19, %v460_v14 }
 0x125   : > { %840 = vmatmul.mubr.msk.f32.vlgmr.msra.gmra.mrb[0].mxu1 %vm477_vm15, %v469_v18 }
 0x126   : > { %498 = vmatpush1.msra.mxu0 %v464_v20 }
 0x127   : > { %807 = vmatmul.mubr.msk.f32.vlgmr.msra.gmra.mrb[0].mxu0 %vm477_vm15, %v469_v18 }
 0x130   : > { %v475_v25 = vpop.permute.xlu1 %474 }
 0x1f8   : > { %v618_v28 = vpop.f32.mrb[0].mxu1 }
 0x1f9   : > { %v619_v30 = vadd.f32 %v618_v28, %v475_v25  ;;  %v841_v31 = vpop.f32.mrb[1].mxu1 }
 0x1fa   : > { %v547_v32 = vpop.f32.mrb[0].mxu0 }
 0x1fb   : > { %v548_v34 = vadd.f32 %v547_v32, %v475_v25  ;;  %v549_v35 = vpop.f32.mrb[1].mxu0  ;;  %v640_v36 = vmul.f32 %v634_v27, %v619_v30 }
 0x1fc   : > { %v550_v37 = vadd.f32 %v549_v35, %v475_v25 }
 0x1fd   : > { %v638_v38 = vmul.f32 %v626_v29, %v548_v34  ;;  %644 = vst.msk [vmem:[%s311_s30 + $0x10] sm:$0xff] %vm643_vm0, %v640_v36  ;;  %v646_v40 = vsel %vm643_vm0, %v640_v36, 0.0 }
 0x1fe   : > { %v639_v39 = vmul.f32 %v630_v33, %v550_v37 }
 0x1ff   : > { %641 = vst [vmem:[%s311_s30] sm:$0xff] %v638_v38 }
 0x200   : > { %642 = vst [vmem:[%s311_s30 + $0x8] sm:$0xff] %v639_v39  ;;  %v645_v41 = vadd.f32 %v639_v39, %v638_v38 }
 0x202   : > { %v647_v42 = vadd.f32 %v646_v40, %v645_v41 }
 0x204   : > { %648 = vadd.xlane.f32.xlu0 %v647_v42 }
 0x291   : > { %v649_v43 = vpop.xlane.xlu0 %648 }
 0x292   : > { %v650_v44 = vmul.f32 0.00390625, %v649_v43  ;;  %658 = vst.msk [vmem:[%s315_s11] sm:$0xff] %vm657_vm1, %v649_v43 }
 0x294   : > { %v651_v45 = vsub.f32 %v638_v38, %v650_v44  ;;  %v652_v46 = vsub.f32 %v639_v39, %v650_v44  ;;  %v653_v47 = vsub.f32 %v640_v36, %v650_v44 }
 0x296   : > { %v654_v48 = vmul.f32 %v651_v45, %v626_v29  ;;  %v655_v49 = vmul.f32 %v652_v46, %v630_v33  ;;  %v656_v50 = vmul.f32 %v653_v47, %v634_v27 }
 0x298   : > { %v659_v51 = vmul.f32 %v654_v48, %v654_v48  ;;  %v660_v52 = vmul.f32 %v655_v49, %v655_v49  ;;  %v661_v53 = vmul.f32 %v656_v50, %v656_v50 }
 0x29a   : > { %v662_v54 = vadd.f32 %v660_v52, %v659_v51  ;;  %v663_v55 = vsel %vm643_vm0, %v661_v53, 0.0 }
 0x29c   : > { %v664_v56 = vadd.f32 %v663_v55, %v662_v54 }
 0x29e   : > { %665 = vadd.xlane.f32.xlu1 %v664_v56 }
 0x32b   : > { %v666_v57 = vpop.xlane.xlu1 %665 }
 0x32c   : > { %667 = vst.msk [vmem:[%s319_s13] sm:$0xff] %vm657_vm1, %v666_v57 }
 0x32d PF: > { %s18_s24 = sadd.s32 1, %s939_s24  }
 0x32e   : > { %p15_p4 = scmp.ge.s32.totalorder %s18_s24, 4  }
 0x330   :  { %17 = sbr.rel (!%p15_p4) target bundleno = 1 (0x1), region = 97 }

// kernel: up_forward.7
= control target key start
LH: loop header
LB: loop body
LE: loop exit
PB: predicated region body
PF: predicated region fallthrough
CT: control target
= control target key end

     0   :  { %s355_s15 = smov 0   ;;  %s381_s0 = inlined_call_operand.vmem [shape: f32[2,8,324], index: 0, kind: input, shape index: {}]   ;;  %s382_s1 = inlined_call_operand.vmem [shape: f32[8,1], index: 1, kind: input, shape index: {}]   ;;  %s383_s2 = inlined_call_operand.vmem [shape: f32[8,1], index: 2, kind: input, shape index: {}]   ;;  %s384_s3 = inlined_call_operand.vmem [shape: f32[1,324], index: 3, kind: input, shape index: {}]   ;;  %s385_s4 = inlined_call_operand.vmem [shape: f32[2,8,324], index: 4, kind: output, shape index: {}]  }
   0x1 LB: > { %s301_s16 = sadd.s32 4294967295, %s327_s15   ;;  %p305_p0 = scmp.ge.s32.totalorder %s327_s15, 1  ;;  %s327_s15 = sphi %s355_s15, %s14_s15  }
   0x2   : > { %p162_p1 = scmp.lt.s32.totalorder %s327_s15, 3 }
   0x4   : > { %p163_p2 = pnand %p305_p0, %p162_p1 }
   0x5   : > { %v201_v0 = vld [vmem:[%s382_s1] sm:$0xff] (!%p163_p2)  ;;  %v329_v1 = vmov (!%p163_p2), 0   ;;  %p188_p3 = scmp.lt.s32.totalorder (!%p163_p2), %s301_s16, 1  ;;  %v224_v3 = vlaneseq (!%p163_p2)  ;;  %vm244_vm0 = vcmask (!%p163_p2), 556032  }
   0x6   : > { %166 = sbr.rel (%p163_p2) target bundleno = 147 (0x93), region = 36  ;;  %320 = vset.pattern.permute.xlu0 (!%p163_p2), %v329_v1  ;;  %v210_v2 = vld [vmem:[%s383_s2] sm:$0xff] (!%p163_p2) }
   0x7   : > { %204 = vperm.xlu0 (!%p163_p2), %320, %v201_v0   ;;  %v225_v4 = vshrl.u32 (!%p163_p2), %v224_v3, 7  ;;  %v222_v11 = vld [vmem:[%s384_s3] sm:$0x7] (!%p163_p2) }
   0x9   : > { %v226_v9 = vsub.s32 (!%p163_p2), 0, %v225_v4  ;;  %v230_v10 = vsub.s32 (!%p163_p2), 1, %v225_v4  ;;  %v234_v12 = vsub.s32 (!%p163_p2), 2, %v225_v4 }
   0xb   : > { %213 = vperm.xlu0 (!%p163_p2), %320, %v210_v2   ;;  %v227_v16 = vrot.slane (!%p163_p2), %v222_v11, %v226_v9  ;;  %v231_v17 = vrot.slane (!%p163_p2), %v222_v11, %v230_v10  ;;  %v235_v19 = vrot.slane (!%p163_p2), %v222_v11, %v234_v12 }
   0xd   : > { %s387_s16 = smov (!%p188_p3, %s301_s16), 1 }
   0xe   : > { %s310_s21 = smul.u32 24, %s387_s16 }
  0x10   : > { %s192_s24 = scalar_lea.vmem %s381_s0, %s310_s21  ;;  %s197_s29 = scalar_lea.vmem %s385_s4, %s310_s21 }
  0x11   : > { %v198_v6 = vld [vmem:[%s192_s24] sm:$0xff]  ;;  %v199_v7 = vld [vmem:[%s192_s24 + $0x8] sm:$0xff]  ;;  %v200_v8 = vld [vmem:[%s192_s24 + $0x10] sm:$0xff] }
  0x86   : > { %v205_v5 = vpop.permute.xlu0 %204 }
  0x87   : > { %v207_v13 = vmul.f32 %v205_v5, %v198_v6  ;;  %v208_v14 = vmul.f32 %v205_v5, %v199_v7  ;;  %v209_v15 = vmul.f32 %v205_v5, %v200_v8 }
  0x8a   : > { %v214_v18 = vpop.permute.xlu0 %213 }
  0x8b   : > { %v216_v20 = vadd.f32 %v214_v18, %v207_v13  ;;  %v217_v21 = vadd.f32 %v214_v18, %v208_v14  ;;  %v218_v22 = vadd.f32 %v214_v18, %v209_v15 }
  0x8d   : > { %v219_v23 = vmax.f32 %v216_v20, 0.0  ;;  %v220_v24 = vmax.f32 %v217_v21, 0.0  ;;  %v221_v25 = vmax.f32 %v218_v22, 0.0 }
  0x8f   : > { %v239_v26 = vmul.f32 %v227_v16, %v219_v23  ;;  %v240_v27 = vmul.f32 %v231_v17, %v220_v24  ;;  %v241_v28 = vmul.f32 %v235_v19, %v221_v25 }
  0x91   : > { %242 = vst [vmem:[%s197_s29] sm:$0xff] %v239_v26  ;;  %243 = vst [vmem:[%s197_s29 + $0x8] sm:$0xff] %v240_v27 }
  0x92   : > { %245 = vst.msk [vmem:[%s197_s29 + $0x10] sm:$0xff] %vm244_vm0, %v241_v28 }
  0x93 PF: > { %s14_s15 = sadd.s32 1, %s327_s15  }
  0x94   : > { %p11_p4 = scmp.ge.s32.totalorder %s14_s15, 4  }
  0x96   :  { %13 = sbr.rel (!%p11_p4) target bundleno = 1 (0x1), region = 66 }

// kernel: up_forward.5
= control target key start
LH: loop header
LB: loop body
LE: loop exit
PB: predicated region body
PF: predicated region fallthrough
CT: control target
= control target key end

     0   :  { %s810_s12 = smov 0   ;;  %s882_s0 = inlined_call_operand.vmem [shape: f32[8,16], index: 0, kind: input, shape index: {}]   ;;  %s883_s1 = inlined_call_operand.vmem [shape: f32[16,8], index: 1, kind: input, shape index: {}]   ;;  %s884_s2 = inlined_call_operand.vmem [shape: f32[2,4,8,8], index: 2, kind: input, shape index: {}]   ;;  %s885_s3 = inlined_call_operand.vmem [shape: f32[2,4,18,18], index: 3, kind: output, shape index: {}]  }
   0x1 LB: > { %s695_s13 = sadd.s32 4294967295, %s786_s12   ;;  %p699_p0 = scmp.ge.s32.totalorder %s786_s12, 1  ;;  %s786_s12 = sphi %s810_s12, %s13_s12  }
   0x2   : > { %p137_p1 = scmp.lt.s32.totalorder %s786_s12, 3 }
   0x4   : > { %p138_p2 = pnand %p699_p0, %p137_p1 }
   0x5   : > { %v189_v0 = vld [vmem:[%s882_s0] sm:$0xff] (!%p138_p2)  ;;  %p161_p3 = scmp.lt.s32.totalorder (!%p138_p2), %s695_s13, 1  ;;  %vm190_vm0 = vcmask (!%p138_p2), 64512   ;;  %v289_v8 = vld [vmem:[%s883_s1 + $0x8] sm:$0xff] (!%p138_p2)  ;;  %vm171_vm1 = vcmask (!%p138_p2), 146432   ;;  %vm174_vm2 = vcmask (!%p138_p2), 140288  }
   0x6   : > { %141 = sbr.rel (%p138_p2) target bundleno = 577 (0x241), region = 32  ;;  %741 = vmatprep.subr.mxu0 (!%p138_p2), %v189_v0  ;;  %v288_v5 = vld [vmem:[%s883_s1] sm:$0xff] (!%p138_p2)  ;;  %v788_v11 = vmov (!%p138_p2), 0.0   ;;  %s789_s28 = smov (!%p138_p2), 1   ;;  %vm379_vm3 = vcmask (!%p138_p2), 138248  }
   0x7   : > { %742 = vmatpush3.msra.mxu0 (!%p138_p2), %v189_v0  ;;  %751 = vmatprep.mubr.msk.f32.mxu1 (!%p138_p2), %vm190_vm0, %v288_v5 }
   0xd   : > { %s887_s13 = smov (!%p161_p3, %s695_s13), 1 }
   0xe   : > { %s723_s16 = sshll.u32 %s887_s13, 5  ;;  %s769_s24 = smul.u32 96, %s887_s13 }
   0xf   : > { %s165_s19 = scalar_lea.vmem %s884_s2, %s723_s16 }
  0x10   : > { %v185_v1 = vld [vmem:[%s165_s19] sm:$0xff]  ;;  %v186_v2 = vld [vmem:[%s165_s19 + $0x8] sm:$0xff]  ;;  %v187_v3 = vld [vmem:[%s165_s19 + $0x10] sm:$0xff]  ;;  %s849_s27 = scalar_lea.vmem %s885_s3, %s769_s24 }
  0x11   : > { %743 = vmatprep.mubr.msk.f32.mxu0 %vm190_vm0, %v185_v1  ;;  %v188_v4 = vld [vmem:[%s165_s19 + $0x18] sm:$0xff]  ;;  %173 = vst.msk [vmem:[%s849_s27 + $0x8] sm:$0xff] %vm171_vm1, %v788_v11  ;;  %172 = vst.msk [vmem:[%s849_s27] sm:$0xff] %vm171_vm1, %v788_v11 }
  0x12   : > { %744 = vmatmul.mubr.msk.f32.vlgmr.msra.gmra.mrb[0].mxu0 %vm190_vm0, %v186_v2  ;;  %175 = vst.msk [vmem:[%s849_s27 + $0x10] sm:$0x3] %vm174_vm2, %v788_v11  ;;  %178 = vst.msk [vmem:[%s849_s27 + $0x28] sm:$0x3] %vm174_vm2, %v788_v11 }
  0x13   : > { %746 = vmatprep.mubr.msk.f32.mxu0 %vm190_vm0, %v187_v3  ;;  %176 = vst.msk [vmem:[%s849_s27 + $0x18] sm:$0xff] %vm171_vm1, %v788_v11  ;;  %177 = vst.msk [vmem:[%s849_s27 + $0x20] sm:$0xff] %vm171_vm1, %v788_v11 }
  0x14   : > { %179 = vst.msk [vmem:[%s849_s27 + $0x30] sm:$0xff] %vm171_vm1, %v788_v11  ;;  %180 = vst.msk [vmem:[%s849_s27 + $0x38] sm:$0xff] %vm171_vm1, %v788_v11 }
  0x15   : > { %181 = vst.msk [vmem:[%s849_s27 + $0x40] sm:$0x3] %vm174_vm2, %v788_v11  ;;  %184 = vst.msk [vmem:[%s849_s27 + $0x58] sm:$0x3] %vm174_vm2, %v788_v11 }
  0x16   : > { %747 = vmatmul.mubr.msk.f32.gmra.mrb[2].mxu0 %vm190_vm0, %v188_v4  ;;  %182 = vst.msk [vmem:[%s849_s27 + $0x48] sm:$0xff] %vm171_vm1, %v788_v11  ;;  %183 = vst.msk [vmem:[%s849_s27 + $0x50] sm:$0xff] %vm171_vm1, %v788_v11 }
  0x17   : > { %761 = vmatprep.mubr.msk.f32.mxu0 %vm190_vm0, %v288_v5 }
  0xe5   : > { %v745_v6 = vpop.f32.mrb[0].mxu0 }
  0xe6   : > { %v269_v7 = vpop.f32.mrb[1].mxu0 }
  0xe7   : > { %749 = vmatprep.subr.mxu1 %v269_v7 }
  0xe8   : > { %750 = vmatpush3.msra.mxu1 %v269_v7 }
  0xe9   : > { %v748_v9 = vpop.f32.mrb[2].mxu0  ;;  %752 = vmatmul.mubr.msk.f32.vlgmr.msra.gmra.mrb[0].mxu1 %vm190_vm0, %v289_v8  ;;  %754 = vmatprep.subr.mxu1 %v745_v6 }
  0xea   : > { %v279_v10 = vpop.f32.mrb[3].mxu0  ;;  %755 = vmatpush3.msra.mxu1 %v745_v6  ;;  %756 = vmatprep.mubr.msk.f32.mxu1 %vm190_vm0, %v288_v5 }
  0xeb   : > { %759 = vmatprep.subr.mxu0 %v279_v10  ;;  %764 = vmatprep.subr.mxu1 %v748_v9 }
  0xec   : > { %760 = vmatpush3.msra.mxu0 %v279_v10 }
  0xed   : > { %757 = vmatmul.mubr.msk.f32.vlgmr.msra.gmra.mrb[2].mxu1 %vm190_vm0, %v289_v8  ;;  %762 = vmatmul.mubr.msk.f32.vlgmr.msra.gmra.mrb[4].mxu0 %vm190_vm0, %v289_v8 }
  0xee   : > { %765 = vmatpush3.msra.mxu1 %v748_v9  ;;  %766 = vmatprep.mubr.msk.f32.mxu1 %vm190_vm0, %v288_v5 }
  0xf1   : > { %767 = vmatmul.mubr.msk.f32.vlgmr.msra.gmra.mrb[4].mxu1 %vm190_vm0, %v289_v8 }
 0x1bc   : > { %v753_v12 = vpop.f32.mrb[0].mxu1 }
 0x1bd   : > { %375 = vrot.lane.b32.xlu0 %v753_v12, %s789_s28  ;;  %v362_v13 = vpop.f32.mrb[1].mxu1 }
 0x1c0   : > { %v758_v14 = vpop.f32.mrb[2].mxu1  ;;  %v763_v15 = vpop.f32.mrb[4].mxu0 }
 0x1c1   : > { %373 = vrot.lane.b32.xlu0 %v362_v13, %s789_s28  ;;  %461 = vrot.lane.b32.xlu1 %v758_v14, %s789_s28  ;;  %v448_v16 = vpop.f32.mrb[3].mxu1  ;;  %v534_v17 = vpop.f32.mrb[5].mxu0 }
 0x1c4   : > { %v768_v18 = vpop.f32.mrb[4].mxu1 }
 0x1c5   : > { %547 = vrot.lane.b32.xlu1 %v763_v15, %s789_s28  ;;  %545 = vrot.lane.b32.xlu0 %v534_v17, %s789_s28  ;;  %v620_v19 = vpop.f32.mrb[5].mxu1 }
 0x1c9   : > { %459 = vrot.lane.b32.xlu1 %v448_v16, %s789_s28  ;;  %631 = vrot.lane.b32.xlu0 %v620_v19, %s789_s28 }
 0x1cd   : > { %633 = vrot.lane.b32.xlu1 %v768_v18, %s789_s28 }
 0x22f   : > { %v376_v20 = vpop.permute.xlu0 %375 }
 0x230   : > { %381 = vst.msk [vmem:[%s849_s27 + $0x9] sm:$0xff] %vm379_vm3, %v376_v20 }
 0x233   : > { %v374_v21 = vpop.permute.xlu0 %373  ;;  %v462_v22 = vpop.permute.xlu1 %461 }
 0x234   : > { %380 = vst.msk [vmem:[%s849_s27 + $0x1] sm:$0xff] %vm379_vm3, %v374_v21  ;;  %712 = vst.msk [vmem:[%s849_s27 + $0x21] sm:$0xff] %vm379_vm3, %v462_v22 }
 0x237   : > { %v548_v23 = vpop.permute.xlu1 %547  ;;  %v546_v24 = vpop.permute.xlu0 %545 }
 0x238   : > { %716 = vst.msk [vmem:[%s849_s27 + $0x39] sm:$0xff] %vm379_vm3, %v548_v23  ;;  %715 = vst.msk [vmem:[%s849_s27 + $0x31] sm:$0xff] %vm379_vm3, %v546_v24 }
 0x23b   : > { %v460_v25 = vpop.permute.xlu1 %459  ;;  %v632_v26 = vpop.permute.xlu0 %631 }
 0x23c   : > { %711 = vst.msk [vmem:[%s849_s27 + $0x19] sm:$0xff] %vm379_vm3, %v460_v25  ;;  %719 = vst.msk [vmem:[%s849_s27 + $0x49] sm:$0xff] %vm379_vm3, %v632_v26 }
 0x23f   : > { %v634_v27 = vpop.permute.xlu1 %633 }
 0x240   : > { %720 = vst.msk [vmem:[%s849_s27 + $0x51] sm:$0xff] %vm379_vm3, %v634_v27 }
 0x241 PF: > { %s13_s12 = sadd.s32 1, %s786_s12  }
 0x242   : > { %p10_p4 = scmp.ge.s32.totalorder %s13_s12, 4  }
 0x244   :  { %12 = sbr.rel (!%p10_p4) target bundleno = 1 (0x1), region = 65 }

// kernel: up_forward.8
= control target key start
LH: loop header
LB: loop body
LE: loop exit
PB: predicated region body
PF: predicated region fallthrough
CT: control target
= control target key end

     0   :  { %s903_s21 = smov 0   ;;  %s985_s0 = inlined_call_operand.vmem [shape: f32[1,324], index: 0, kind: input, shape index: {}]   ;;  %s986_s1 = inlined_call_operand.vmem [shape: f32[2,8,324], index: 1, kind: input, shape index: {}]   ;;  %s987_s2 = inlined_call_operand.vmem [shape: f32[8,72], index: 2, kind: input, shape index: {}]   ;;  %s988_s3 = inlined_call_operand.vmem [shape: f32[8,1], index: 3, kind: input, shape index: {}]   ;;  %s989_s4 = inlined_call_operand.vmem [shape: f32[2,8,324], index: 4, kind: output, shape index: {0}]   ;;  %s990_s5 = inlined_call_operand.vmem [shape: f32[2,8,1], index: 5, kind: output, shape index: {1}]   ;;  %s991_s6 = inlined_call_operand.vmem [shape: f32[2,8,1], index: 6, kind: output, shape index: {2}]  }
   0x1 LB: > { %s717_s22 = sadd.s32 4294967295, %s853_s21   ;;  %p721_p0 = scmp.ge.s32.totalorder %s853_s21, 1  ;;  %s853_s21 = sphi %s903_s21, %s17_s21  }
   0x2   : > { %p217_p1 = scmp.lt.s32.totalorder %s853_s21, 3 }
   0x4   : > { %p218_p2 = pnand %p721_p0, %p217_p1 }
   0x5   : > { %p255_p3 = scmp.lt.s32.totalorder (!%p218_p2), %s717_s22, 1  ;;  %vm273_vm0 = vcmask (!%p218_p2), 154624   ;;  %vm275_vm1 = vcmask (!%p218_p2), 868024   ;;  %v855_v0 = vmov (!%p218_p2), 0.0   ;;  %s856_s27 = smov (!%p218_p2), 19   ;;  %vm294_vm2 = vcmask (!%p218_p2), 1047704  }
   0x6   : > { %221 = sbr.rel (%p218_p2) target bundleno = 809 (0x329), region = 36  ;;  %274 = vst.msk [vmem:[#allocation2] sm:$0xff] (!%p218_p2), %vm273_vm0, %v855_v0  ;;  %477 = vmatprep.mubr.f32.mxu0 (!%p218_p2), %v855_v0  ;;  %vm297_vm3 = vcmask (!%p218_p2), 711680   ;;  %s857_s28 = smov (!%p218_p2), 126   ;;  %v859_v10 = vmov (!%p218_p2), 0.0|0.0   ;;  %vm865_vm4 = vmmov (!%p218_p2), 0  }
   0x7   : > { %276 = vst.msk [vmem:[#allocation2 + $0x10] sm:$0xff] (!%p218_p2), %vm275_vm1, %v855_v0  ;;  %s858_s29 = smov (!%p218_p2), 127   ;;  %777 = vmatprep.subr.bf16.mxu1 (!%p218_p2), %v859_v10  ;;  %s860_s30 = smov (!%p218_p2), 109   ;;  %758 = vmatprep.mubr.msk.f32.mxu1 (!%p218_p2), %vm865_vm4, %v855_v0  ;;  %v866_v13 = vmov (!%p218_p2), 0   ;;  %v403_v14 = vld [vmem:[%s988_s3] sm:$0xff] (!%p218_p2)  ;;  %vm311_vm5 = vcmask (!%p218_p2), 1039360  }
   0x8   : > { %s861_s7 = smov (!%p218_p2), 110   ;;  %s862_s8 = smov (!%p218_p2), 92   ;;  %846 = vset.pattern.permute.xlu0 (!%p218_p2), %v866_v13  ;;  %vm335_vm6 = vcmask (!%p218_p2), 900096   ;;  %vm323_vm7 = vcmask (!%p218_p2), 1031168   ;;  %vm359_vm8 = vcmask (!%p218_p2), 883712   ;;  %vm347_vm9 = vcmask (!%p218_p2), 891904  }
   0x9   : > { %s863_s9 = smov (!%p218_p2), 108   ;;  %s864_s10 = smov (!%p218_p2), 91   ;;  %vm383_vm10 = vcmask (!%p218_p2), 744448   ;;  %vm371_vm11 = vcmask (!%p218_p2), 752640   ;;  %vm395_vm12 = vcmask (!%p218_p2), 736256   ;;  %vm409_vm13 = vcmask (!%p218_p2), 588800  }
   0xa   : > { %s867_s11 = smov (!%p218_p2), 90   ;;  %vm575_vm14 = vcmask (!%p218_p2), 556032   ;;  %vm589_vm15 = vcmask (!%p218_p2), 7168  }
   0xd   : > { %s993_s22 = smov (!%p255_p3, %s717_s22), 1 }
   0xe   : > { %s789_s23 = smul.u32 24, %s993_s22 }
  0x10   : > { %s259_s26 = scalar_lea.vmem %s986_s1, %s789_s23  ;;  %s264_s20 = scalar_lea.vmem %s989_s4, %s789_s23 }
  0x11   : > { %v277_v1 = vld [vmem:[%s259_s26] sm:$0xff]  ;;  %v279_v2 = vld [vmem:[%s259_s26 + $0x10] sm:$0xff]  ;;  %v278_v3 = vld [vmem:[%s259_s26 + $0x8] sm:$0xff]  ;;  %s724_s23 = sshll.u32 %s993_s22, 3 }
  0x12   : > { %283 = vrot.lane.b32.xlu0 %v277_v1, %s856_s27  ;;  %287 = vrot.lane.b32.xlu1 %v279_v2, %s856_s27  ;;  %s268_s26 = scalar_lea.vmem %s990_s5, %s724_s23 }
  0x16   : > { %285 = vrot.lane.b32.xlu0 %v278_v3, %s856_s27 }
  0x84   : > { %v284_v4 = vpop.permute.xlu0 %283  ;;  %v288_v5 = vpop.permute.xlu1 %287 }
  0x85   : > { %295 = vst.msk [vmem:[#allocation2] sm:$0xff] %vm294_vm2, %v284_v4 }
  0x88   : > { %v286_v6 = vpop.permute.xlu0 %285 }
  0x89   : > { %v924_v7 = vsel %vm273_vm0, %v284_v4, %v286_v6  ;;  %v290_v8 = vsel %vm273_vm0, %v286_v6, %v288_v5 }
  0x8a   : > { %298 = vst.msk [vmem:[#allocation2 + $0x10] sm:$0xff] %vm297_vm3, %v290_v8 }
  0x8c   : > { %v927_v9 = vld [vmem:[#allocation2] sm:$0xff] }
  0x8d   : > { %317 = vrot.lane.b32.xlu1 %v927_v9, %s857_s28  ;;  %305 = vrot.lane.b32.xlu0 %v927_v9, %s858_s29 }
  0x91   : > { %341 = vrot.lane.b32.xlu1 %v927_v9, %s860_s30  ;;  %329 = vrot.lane.b32.xlu0 %v927_v9, %s861_s7  ;;  %v301_v11 = vld [vmem:[#allocation2 + $0x10] sm:$0xff] }
  0x92   : > { %v821_v12 = vpack.i.bf16 %v301_v11, %v924_v7 }
  0x95   : > { %365 = vrot.lane.b32.xlu1 %v927_v9, %s862_s8  ;;  %353 = vrot.lane.b32.xlu0 %v927_v9, %s863_s9 }
  0x99   : > { %822 = vrot.lane.b32.xlu0 %v821_v12, %s861_s7  ;;  %812 = vrot.lane.b32.xlu1 %v821_v12, %s858_s29 }
  0x9d   : > { %832 = vrot.lane.b32.xlu0 %v821_v12, %s863_s9  ;;  %817 = vrot.lane.b32.xlu1 %v821_v12, %s857_s28  ;;  %s272_s28 = scalar_lea.vmem %s991_s6, %s724_s23 }
  0xa1   : > { %842 = vrot.lane.b32.xlu0 %v821_v12, %s864_s10  ;;  %827 = vrot.lane.b32.xlu1 %v821_v12, %s860_s30 }
  0xa5   : > { %377 = vrot.lane.b32.xlu0 %v927_v9, %s864_s10  ;;  %837 = vrot.lane.b32.xlu1 %v821_v12, %s862_s8  ;;  %v555_v12 = vlaneseq }
  0xa7   : > { %v556_v13 = vshrl.u32 %v555_v12, 7 }
  0xa9   : > { %393 = vrot.lane.b32.xlu0 %v301_v11, %s867_s11  ;;  %391 = vrot.lane.b32.xlu1 %v924_v7, %s867_s11 }
  0xad   : > { %389 = vrot.lane.b32.xlu1 %v927_v9, %s867_s11  ;;  %406 = vperm.xlu0 %846, %v403_v14   ;;  %v565_v14 = vsub.s32 2, %v556_v13 }
  0xff   : > { %v318_v15 = vpop.permute.xlu1 %317  ;;  %v306_v16 = vpop.permute.xlu0 %305 }
 0x103   : > { %v342_v17 = vpop.permute.xlu1 %341  ;;  %v330_v18 = vpop.permute.xlu0 %329 }
 0x107   : > { %v944_v19 = vpop.permute.xlu1 %365  ;;  %v354_v20 = vpop.permute.xlu0 %353 }
 0x10b   : > { %v813_v21 = vpop.permute.xlu1 %812  ;;  %v823_v22 = vpop.permute.xlu0 %822 }
 0x10c   : > { %v815_v23 = vunpack.i.h.bf16 %v813_v21  ;;  %v814_v24 = vunpack.i.l.bf16 %v813_v21  ;;  %v825_v25 = vunpack.i.h.bf16 %v823_v22  ;;  %v824_v26 = vunpack.i.l.bf16 %v823_v22 }
 0x10e   : > { %v778_v27 = vpack.c.bf16 %v815_v23, %v301_v11  ;;  %v313_v28 = vsel %vm311_vm5, %v814_v24, %v815_v23  ;;  %v312_v29 = vsel %vm311_vm5, %v306_v16, %v814_v24  ;;  %v337_v38 = vsel %vm335_vm6, %v824_v26, %v825_v25 }
 0x10f   : > { %v818_v30 = vpop.permute.xlu1 %817  ;;  %v833_v31 = vpop.permute.xlu0 %832  ;;  %v761_v32 = vpack.c.bf16 %v313_v28, %v924_v7  ;;  %v763_v33 = vpack.c.bf16 %v312_v29, %v927_v9  ;;  %v336_v42 = vsel %vm335_vm6, %v330_v18, %v824_v26  ;;  %v401_v9 = vld [vmem:[%s987_s2] sm:$0xff] }
 0x110   : > { %v820_v34 = vunpack.i.h.bf16 %v818_v30  ;;  %v819_v35 = vunpack.i.l.bf16 %v818_v30  ;;  %779 = vmatpush3.bf16.msra.mxu1 %v778_v27  ;;  %v835_v36 = vunpack.i.h.bf16 %v833_v31  ;;  %v834_v37 = vunpack.i.l.bf16 %v833_v31 }
 0x111   : > { %762 = vmatprep.subr.bf16.mxu0 %v761_v32  ;;  %780 = vmatprep.subr.bf16.mxu1 %v859_v10 }
 0x112   : > { %v781_v39 = vpack.c.bf16 %v825_v25, %v820_v34  ;;  %764 = vmatpush1.bf16.msra.mxu0 %v763_v33  ;;  %v325_v40 = vsel %vm323_vm7, %v819_v35, %v820_v34  ;;  %v324_v41 = vsel %vm323_vm7, %v318_v15, %v819_v35  ;;  %v361_v51 = vsel %vm359_vm8, %v834_v37, %v835_v36 }
 0x113   : > { %v828_v43 = vpop.permute.xlu1 %827  ;;  %v843_v44 = vpop.permute.xlu0 %842  ;;  %v765_v45 = vpack.c.bf16 %v337_v38, %v325_v40  ;;  %v767_v46 = vpack.c.bf16 %v336_v42, %v324_v41  ;;  %v360_v55 = vsel %vm359_vm8, %v354_v20, %v834_v37  ;;  %v557_v15 = vsub.s32 0, %v556_v13 }
 0x114   : > { %v830_v47 = vunpack.i.h.bf16 %v828_v43  ;;  %v829_v48 = vunpack.i.l.bf16 %v828_v43  ;;  %782 = vmatpush3.bf16.msra.mxu1 %v781_v39  ;;  %v845_v49 = vunpack.i.h.bf16 %v843_v44  ;;  %v844_v50 = vunpack.i.l.bf16 %v843_v44 }
 0x115   : > { %766 = vmatprep.subr.bf16.mxu0 %v765_v45  ;;  %783 = vmatprep.subr.bf16.mxu1 %v859_v10 }
 0x116   : > { %v784_v52 = vpack.c.bf16 %v835_v36, %v830_v47  ;;  %768 = vmatpush1.bf16.msra.mxu0 %v767_v46  ;;  %v349_v53 = vsel %vm347_vm9, %v829_v48, %v830_v47  ;;  %v348_v54 = vsel %vm347_vm9, %v342_v17, %v829_v48  ;;  %v385_v62 = vsel %vm383_vm10, %v844_v50, %v845_v49 }
 0x117   : > { %v838_v56 = vpop.permute.xlu1 %837  ;;  %v378_v57 = vpop.permute.xlu0 %377  ;;  %v769_v58 = vpack.c.bf16 %v361_v51, %v349_v53  ;;  %v771_v59 = vpack.c.bf16 %v360_v55, %v348_v54  ;;  %v561_v17 = vsub.s32 1, %v556_v13 }
 0x118   : > { %v840_v60 = vunpack.i.h.bf16 %v838_v56  ;;  %v839_v61 = vunpack.i.l.bf16 %v838_v56  ;;  %785 = vmatpush3.bf16.msra.mxu1 %v784_v52  ;;  %v384_v2 = vsel %vm383_vm10, %v378_v57, %v844_v50 }
 0x119   : > { %770 = vmatprep.subr.bf16.mxu0 %v769_v58  ;;  %786 = vmatprep.subr.bf16.mxu1 %v859_v10 }
 0x11a   : > { %v787_v63 = vpack.c.bf16 %v845_v49, %v840_v60  ;;  %v372_v1 = vsel %vm371_vm11, %v944_v19, %v839_v61  ;;  %772 = vmatpush1.bf16.msra.mxu0 %v771_v59  ;;  %v373_v3 = vsel %vm371_vm11, %v839_v61, %v840_v60 }
 0x11b   : > { %v775_v4 = vpack.c.bf16 %v384_v2, %v372_v1  ;;  %v392_v5 = vpop.permute.xlu1 %391  ;;  %v394_v6 = vpop.permute.xlu0 %393  ;;  %v773_v7 = vpack.c.bf16 %v385_v62, %v373_v3 }
 0x11c   : > { %788 = vmatpush3.bf16.msra.mxu1 %v787_v63  ;;  %v397_v8 = vsel %vm395_vm12, %v392_v5, %v394_v6 }
 0x11d   : > { %774 = vmatprep.subr.bf16.mxu0 %v773_v7  ;;  %756 = vmatprep.subr.mxu1 %v855_v0  ;;  %v402_v0 = vld [vmem:[%s985_s0] sm:$0x7] }
 0x11e   : > { %776 = vmatpush1.bf16.msra.mxu0 %v775_v4  ;;  %v566_v18 = vrot.slane %v402_v0, %v565_v14  ;;  %v558_v20 = vrot.slane %v402_v0, %v557_v15  ;;  %v562_v24 = vrot.slane %v402_v0, %v561_v17 }
 0x11f   : > { %v390_v10 = vpop.permute.xlu1 %389  ;;  %429 = vmatprep.subr.mxu0 %v397_v8 }
 0x120   : > { %757 = vmatpush3.msra.mxu1 %v394_v6  ;;  %v396_v11 = vsel %vm395_vm12, %v390_v10, %v392_v5 }
 0x121   : > { %759 = vmatmul.mubr.msk.f32.vlgmr.msra.gmra.mrb[0].mxu1 %vm409_vm13, %v401_v9 }
 0x122   : > { %430 = vmatpush1.msra.mxu0 %v396_v11 }
 0x123   : > { %726 = vmatmul.mubr.msk.f32.vlgmr.msra.gmra.mrb[0].mxu0 %vm409_vm13, %v401_v9 }
 0x12c   : > { %v407_v16 = vpop.permute.xlu0 %406 }
 0x1f4   : > { %v550_v19 = vpop.f32.mrb[0].mxu1 }
 0x1f5   : > { %v551_v21 = vadd.f32 %v550_v19, %v407_v16  ;;  %v760_v22 = vpop.f32.mrb[1].mxu1 }
 0x1f6   : > { %v479_v23 = vpop.f32.mrb[0].mxu0 }
 0x1f7   : > { %v480_v25 = vadd.f32 %v479_v23, %v407_v16  ;;  %v481_v26 = vpop.f32.mrb[1].mxu0  ;;  %v572_v27 = vmul.f32 %v566_v18, %v551_v21 }
 0x1f8   : > { %v482_v28 = vadd.f32 %v481_v26, %v407_v16 }
 0x1f9   : > { %v570_v29 = vmul.f32 %v558_v20, %v480_v25  ;;  %576 = vst.msk [vmem:[%s264_s20 + $0x10] sm:$0xff] %vm575_vm14, %v572_v27  ;;  %v578_v31 = vsel %vm575_vm14, %v572_v27, 0.0 }
 0x1fa   : > { %v571_v30 = vmul.f32 %v562_v24, %v482_v28 }
 0x1fb   : > { %573 = vst [vmem:[%s264_s20] sm:$0xff] %v570_v29 }
 0x1fc   : > { %574 = vst [vmem:[%s264_s20 + $0x8] sm:$0xff] %v571_v30  ;;  %v577_v32 = vadd.f32 %v571_v30, %v570_v29 }
 0x1fe   : > { %v579_v33 = vadd.f32 %v578_v31, %v577_v32 }
 0x200   : > { %580 = vadd.xlane.f32.xlu1 %v579_v33 }
 0x28d   : > { %v581_v34 = vpop.xlane.xlu1 %580 }
 0x28e   : > { %v582_v35 = vmul.f32 0.00390625, %v581_v34  ;;  %590 = vst.msk [vmem:[%s268_s26] sm:$0xff] %vm589_vm15, %v581_v34 }
 0x290   : > { %v583_v36 = vsub.f32 %v570_v29, %v582_v35  ;;  %v584_v37 = vsub.f32 %v571_v30, %v582_v35  ;;  %v585_v38 = vsub.f32 %v572_v27, %v582_v35 }
 0x292   : > { %v586_v39 = vmul.f32 %v583_v36, %v558_v20  ;;  %v587_v40 = vmul.f32 %v584_v37, %v562_v24  ;;  %v588_v41 = vmul.f32 %v585_v38, %v566_v18 }
 0x294   : > { %v591_v42 = vmul.f32 %v586_v39, %v586_v39  ;;  %v592_v43 = vmul.f32 %v587_v40, %v587_v40  ;;  %v593_v44 = vmul.f32 %v588_v41, %v588_v41 }
 0x296   : > { %v594_v45 = vadd.f32 %v592_v43, %v591_v42  ;;  %v595_v46 = vsel %vm575_vm14, %v593_v44, 0.0 }
 0x298   : > { %v596_v47 = vadd.f32 %v595_v46, %v594_v45 }
 0x29a   : > { %597 = vadd.xlane.f32.xlu0 %v596_v47 }
 0x327   : > { %v598_v48 = vpop.xlane.xlu0 %597 }
 0x328   : > { %599 = vst.msk [vmem:[%s272_s28] sm:$0xff] %vm589_vm15, %v598_v48 }
 0x329 PF: > { %s17_s21 = sadd.s32 1, %s853_s21  }
 0x32a   : > { %p14_p4 = scmp.ge.s32.totalorder %s17_s21, 4  }
 0x32c   :  { %16 = sbr.rel (!%p14_p4) target bundleno = 1 (0x1), region = 90 }

</bundles_post_ra>
